<compile_context>
chip_gen: v7x
topology: tpu7x:2x2x1
jax: 0.10.0
libtpu: 0.0.40
codegen_flags: <defaults>
</compile_context>

<pallas_src>
import math

import jax
import jax.numpy as jnp
from jax import lax
from jax.experimental import pallas as pl
from jax.experimental.pallas import tpu as pltpu


# ------------------------------------------------------------------ kernel ---
def neck_kernel(x_ref, xu_ref, xd_ref, w1_ref, b1_ref, w3_ref, b3_ref, o_ref):
    """Fused conv_1x1 + conv_3x3 (padding=1) for one (batch, row-tile) grid step.

    x_ref  : (1, TH, W, Cin) bf16   centre rows of the tile
    xu_ref : (1, 1,  W, Cin) bf16   row above the tile (clamped at image top)
    xd_ref : (1, 1,  W, Cin) bf16   row below the tile (clamped at image bottom)
    w1_ref : (Cin, D)        bf16   1x1 conv weight (I, O)
    b1_ref : (1, D)          f32
    w3_ref : (3, 3*D, D)     bf16   3x3 conv weight, (ky, kx*I, O)
    b3_ref : (1, D)          f32
    o_ref  : (1, TH, W, D)
    """
    _, TH, W, Cin = x_ref.shape
    D = o_ref.shape[3]
    i = pl.program_id(1)
    n_tiles = pl.num_programs(1)

    # --- conv_1x1 over tile + 1-row halo: a single channel matmul -----------
    xt = jnp.concatenate([xu_ref[0], x_ref[0], xd_ref[0]], axis=0)     # (TH+2, W, Cin)
    y1 = jnp.dot(xt.reshape((TH + 2) * W, Cin), w1_ref[...],
                 preferred_element_type=jnp.float32)
    y1 = (y1 + b1_ref[...]).reshape(TH + 2, W, D)                      # f32

    # Zero the halo rows that fall outside the image (conv_3x3 zero padding, H).
    row = lax.broadcasted_iota(jnp.int32, (TH + 2, 1, 1), 0)
    pad_row = jnp.logical_or(jnp.logical_and(row == 0, i == 0),
                             jnp.logical_and(row == TH + 1, i == n_tiles - 1))
    y1 = jnp.where(pad_row, 0.0, y1)

    # Horizontal neighbours via XLU roll + boundary mask (zero padding along W).
    col = lax.broadcasted_iota(jnp.int32, (TH + 2, W, 1), 1)
    left = jnp.where(col == 0, 0.0,
                     pltpu.roll(y1, shift=1, axis=1))            # left[w]  = y1[w-1]
    right = jnp.where(col == W - 1, 0.0,
                      pltpu.roll(y1, shift=W - 1, axis=1))       # right[w] = y1[w+1]

    # Stack dx taps along channels -> conv_3x3 becomes 3 matmuls with K = 3*D.
    cdt = w3_ref.dtype                                           # bf16 into the MXU
    taps = jnp.concatenate([left, y1, right], axis=-1).astype(cdt)   # (TH+2, W, 3D)

    acc = jnp.broadcast_to(b3_ref[...], (TH * W, D))             # f32 accumulator
    for dy in range(3):
        win = taps[dy:dy + TH].reshape(TH * W, 3 * D)
        acc = acc + jnp.dot(win, w3_ref[dy],
                            preferred_element_type=jnp.float32)

    o_ref[0] = acc.reshape(TH, W, D).astype(o_ref.dtype)


# ----------------------------------------------------------------- wrapper ---
def _pick_tile_rows(H, W, target_m=1024):
    """Largest divisor of H giving roughly `target_m` matmul rows per tile."""
    target = max(1, min(H, max(1, target_m // max(W, 1))))
    for th in range(target, 0, -1):
        if H % th == 0:
            return th
    return H


def vitdet_neck_conv(x_nhwc, w1, b1, w3, b3):
    """conv_1x1 -> conv_3x3 (padding=1), both with bias.  NHWC in, NHWC out."""
    B, H, W, Cin = x_nhwc.shape
    D = w1.shape[-1]
    out_dtype = x_nhwc.dtype
    TH = _pick_tile_rows(H, W)
    n_tiles = H // TH

    cdt = jnp.bfloat16
    x_c = x_nhwc.astype(cdt)
    w1_c = jnp.asarray(w1, cdt).reshape(Cin, D)
    # HWIO (3, 3, D, D) -> (ky, kx*I, O) so each dy is a single (3D, D) matmul.
    w3_c = jnp.asarray(w3, cdt).reshape(3, 3 * D, D)
    b1_c = jnp.asarray(b1, jnp.float32).reshape(1, D)
    b3_c = jnp.asarray(b3, jnp.float32).reshape(1, D)

    # VMEM budget: double-buffered in/out blocks + weights + f32/bf16 temporaries.
    itemsize = jnp.dtype(out_dtype).itemsize
    blk_in = (TH + 2) * W * Cin * 2
    blk_out = TH * W * D * itemsize
    weights = Cin * D * 2 + 9 * D * D * 2 + 2 * D * 4
    temps = (TH + 2) * W * D * (3 * 4 + 3 * 2) + 4 * TH * W * D * 4
    est = 2 * (blk_in + blk_out) + 2 * weights + temps
    vmem_limit = int(min(48 * 1024 * 1024, max(32 * 1024 * 1024, est)))

    grid_spec = pltpu.PrefetchScalarGridSpec(
        num_scalar_prefetch=0,
        grid=(B, n_tiles),
        in_specs=[
            pl.BlockSpec((1, TH, W, Cin), lambda b, i: (b, i, 0, 0)),
            pl.BlockSpec((1, 1, W, Cin),
                         lambda b, i: (b, jnp.maximum(i * TH - 1, 0), 0, 0)),
            pl.BlockSpec((1, 1, W, Cin),
                         lambda b, i: (b, jnp.minimum(i * TH + TH, H - 1), 0, 0)),
            pl.BlockSpec((Cin, D), lambda b, i: (0, 0)),
            pl.BlockSpec((1, D), lambda b, i: (0, 0)),
            pl.BlockSpec((3, 3 * D, D), lambda b, i: (0, 0, 0)),
            pl.BlockSpec((1, D), lambda b, i: (0, 0)),
        ],
        out_specs=pl.BlockSpec((1, TH, W, D), lambda b, i: (b, i, 0, 0)),
    )

    return pl.pallas_call(
        neck_kernel,
        out_shape=jax.ShapeDtypeStruct((B, H, W, D), out_dtype),
        grid_spec=grid_spec,
        compiler_params=pltpu.CompilerParams(
            dimension_semantics=("parallel", "parallel"),
            vmem_limit_bytes=vmem_limit),
    )(x_c, x_c, x_c, w1_c, b1_c, w3_c, b3_c)


def position_encoding_sine(B, H, W, d_model, temperature=10000.0, dtype=jnp.float32):
    """SAM2-style PositionEmbeddingSine (normalize=True), NHWC: (B, H, W, d_model).
    Input-independent constant -> plain JAX (computed once; no kernel needed)."""
    num_pos_feats = d_model // 2
    eps = 1e-6
    scale = 2.0 * math.pi

    y_embed = jnp.broadcast_to(jnp.arange(1, H + 1, dtype=jnp.float32)[:, None], (H, W))
    x_embed = jnp.broadcast_to(jnp.arange(1, W + 1, dtype=jnp.float32)[None, :], (H, W))
    y_embed = y_embed / (H + eps) * scale
    x_embed = x_embed / (W + eps) * scale

    dim_t = jnp.arange(num_pos_feats, dtype=jnp.float32)
    dim_t = temperature ** (2.0 * (dim_t // 2) / num_pos_feats)

    pos_x = x_embed[:, :, None] / dim_t
    pos_y = y_embed[:, :, None] / dim_t
    pos_x = jnp.stack((jnp.sin(pos_x[:, :, 0::2]),
                       jnp.cos(pos_x[:, :, 1::2])), axis=3).reshape(H, W, -1)
    pos_y = jnp.stack((jnp.sin(pos_y[:, :, 0::2]),
                       jnp.cos(pos_y[:, :, 1::2])), axis=3).reshape(H, W, -1)
    pos = jnp.concatenate((pos_y, pos_x), axis=2)[None]            # (1, H, W, d_model)
    return jnp.broadcast_to(pos, (B, H, W, d_model)).astype(dtype)


def vitdet_neck_forward(xs, params, d_model):
    """ViTDetNeck.forward: only convs[0] / xs[0] contribute (as in the reference).
    xs are NHWC; out / pos are NHWC (keep the surrounding pipeline NHWC)."""
    # TODO(synk): neck_norm (LayerNorm2d) variant not implemented; this covers the
    #             default neck_norm=None path (conv biases, no norm).
    w1, b1, w3, b3 = params
    out = [None] * len(xs)
    pos = [None] * len(xs)
    x_out = vitdet_neck_conv(xs[0], w1, b1, w3, b3)
    out[0] = x_out
    B, H, W, _ = x_out.shape
    pos[0] = position_encoding_sine(B, H, W, d_model, dtype=x_out.dtype)
    return out, pos


# -------------------------------------------------------------------- main ---
if __name__ == "__main__":
    B, H, W, Cin = 2, 16, 16, 4
    d_model = 32

    key = jax.random.PRNGKey(0)
    k_x, k_w1, k_b1, k_w3, k_b3 = jax.random.split(key, 5)

    # Deterministic synthetic parameters (NHWC input, HWIO weights).
    x_nhwc = jax.random.normal(k_x, (B, H, W, Cin), jnp.float32)
    w1 = jax.random.normal(k_w1, (Cin, d_model), jnp.float32) * 0.1          # (I, O)
    b1 = jax.random.normal(k_b1, (d_model,), jnp.float32) * 0.1
    w3 = jax.random.normal(k_w3, (3, 3, d_model, d_model), jnp.float32) * 0.1  # HWIO
    b3 = jax.random.normal(k_b3, (d_model,), jnp.float32) * 0.1

    out, pos = vitdet_neck_forward([x_nhwc], (w1, b1, w3, b3), d_model)
    jax.block_until_ready(out[0])
    jax.block_until_ready(pos[0])

    # Pure-JAX reference matched to the kernel's bf16-operand / f32-accumulate path.
    xb = x_nhwc.astype(jnp.bfloat16)
    ref1 = lax.conv_general_dilated(
        xb, w1.astype(jnp.bfloat16).reshape(1, 1, Cin, d_model), (1, 1), "VALID",
        dimension_numbers=("NHWC", "HWIO", "NHWC"),
        preferred_element_type=jnp.float32) + b1
    ref1 = ref1.astype(jnp.bfloat16)
    ref2 = lax.conv_general_dilated(
        ref1, w3.astype(jnp.bfloat16), (1, 1), "SAME",
        dimension_numbers=("NHWC", "HWIO", "NHWC"),
        preferred_element_type=jnp.float32) + b3

    assert out[0].shape == (B, H, W, d_model)
    assert pos[0].shape == (B, H, W, d_model)
    max_err = float(jnp.max(jnp.abs(out[0].astype(jnp.float32) - ref2)))
    assert max_err < 2e-2, f"max abs error {max_err}"

    print("KERNEL_OK")
</pallas_src>

<mosaic_0001>
module attributes {stable_mosaic.version = 11 : i64} {
  func.func @neck_kernel(%arg0: i32, %arg1: i32, %arg2: memref<1x16x16x4xbf16, #tpu.memory_space<vmem>>, %arg3: memref<1x1x16x4xbf16, #tpu.memory_space<vmem>>, %arg4: memref<1x1x16x4xbf16, #tpu.memory_space<vmem>>, %arg5: memref<4x32xbf16, #tpu.memory_space<vmem>>, %arg6: memref<1x32xf32, #tpu.memory_space<vmem>>, %arg7: memref<3x96x32xbf16, #tpu.memory_space<vmem>>, %arg8: memref<1x32xf32, #tpu.memory_space<vmem>>, %arg9: memref<1x16x16x32xf32, #tpu.memory_space<vmem>>) attributes {dimension_semantics = [#tpu.dimension_semantics<parallel>, #tpu.dimension_semantics<parallel>], iteration_bounds = array<i64: 2, 1>, scalar_prefetch = 0 : i64, scratch_operands = 0 : i64, tpu.core_type = #tpu.core_type<tc>, window_params = [{transform_indices = @transform_0, window_bounds = array<i64: 1, 16, 16, 4>}, {transform_indices = @transform_1, window_bounds = array<i64: 1, 1, 16, 4>}, {transform_indices = @transform_2, window_bounds = array<i64: 1, 1, 16, 4>}, {pipeline_mode = #tpu.pipeline_mode<synchronous>, transform_indices = @transform_3, window_bounds = array<i64: 4, 32>}, {pipeline_mode = #tpu.pipeline_mode<synchronous>, transform_indices = @transform_4, window_bounds = array<i64: 1, 32>}, {pipeline_mode = #tpu.pipeline_mode<synchronous>, transform_indices = @transform_5, window_bounds = array<i64: 3, 96, 32>}, {pipeline_mode = #tpu.pipeline_mode<synchronous>, transform_indices = @transform_6, window_bounds = array<i64: 1, 32>}, {transform_indices = @transform_7, window_bounds = array<i64: 1, 16, 16, 32>}]} {
    %c0 = arith.constant 0 : index
    %c0_0 = arith.constant 0 : index
    %c0_1 = arith.constant 0 : index
    %c0_2 = arith.constant 0 : index
    %0 = vector.load %arg3[%c0, %c0_0, %c0_1, %c0_2] : memref<1x1x16x4xbf16, #tpu.memory_space<vmem>>, vector<1x1x16x4xbf16>
    %1 = vector.shape_cast %0 : vector<1x1x16x4xbf16> to vector<1x16x4xbf16>
    %c0_3 = arith.constant 0 : index
    %c0_4 = arith.constant 0 : index
    %c0_5 = arith.constant 0 : index
    %c0_6 = arith.constant 0 : index
    %2 = vector.load %arg2[%c0_3, %c0_4, %c0_5, %c0_6] : memref<1x16x16x4xbf16, #tpu.memory_space<vmem>>, vector<1x16x16x4xbf16>
    %3 = vector.shape_cast %2 : vector<1x16x16x4xbf16> to vector<16x16x4xbf16>
    %c0_7 = arith.constant 0 : index
    %c0_8 = arith.constant 0 : index
    %c0_9 = arith.constant 0 : index
    %c0_10 = arith.constant 0 : index
    %4 = vector.load %arg4[%c0_7, %c0_8, %c0_9, %c0_10] : memref<1x1x16x4xbf16, #tpu.memory_space<vmem>>, vector<1x1x16x4xbf16>
    %5 = vector.shape_cast %4 : vector<1x1x16x4xbf16> to vector<1x16x4xbf16>
    %6 = tpu.concatenate %1, %3, %5 in 0 : vector<1x16x4xbf16>, vector<16x16x4xbf16>, vector<1x16x4xbf16> -> vector<18x16x4xbf16>
    %7 = vector.shape_cast %6 : vector<18x16x4xbf16> to vector<288x4xbf16>
    %c0_11 = arith.constant 0 : index
    %c0_12 = arith.constant 0 : index
    %8 = vector.load %arg5[%c0_11, %c0_12] : memref<4x32xbf16, #tpu.memory_space<vmem>>, vector<4x32xbf16>
    %cst = arith.constant dense<0.000000e+00> : vector<288x32xf32>
    %9 = tpu.matmul %7, %8, %cst {dimension_numbers = #tpu.dot_dimension_numbers<[1], [0], [0], [1], [0, 0, 1, 1], [], []>} : vector<288x4xbf16>, vector<4x32xbf16>, vector<288x32xf32> -> vector<288x32xf32>
    %c0_13 = arith.constant 0 : index
    %c0_14 = arith.constant 0 : index
    %10 = vector.load %arg6[%c0_13, %c0_14] : memref<1x32xf32, #tpu.memory_space<vmem>>, vector<1x32xf32>
    %11 = vector.broadcast %10 : vector<1x32xf32> to vector<288x32xf32>
    %12 = arith.addf %9, %11 : vector<288x32xf32>
    %13 = vector.shape_cast %12 : vector<288x32xf32> to vector<18x16x32xf32>
    %14 = tpu.iota {dimensions = array<i32: 0>} : vector<18x1x1xi32>
    %c0_i32 = arith.constant 0 : i32
    %15 = vector.broadcast %c0_i32 : i32 to vector<18x1x1xi32>
    %16 = arith.cmpi eq, %14, %15 : vector<18x1x1xi32>
    %c0_i32_15 = arith.constant 0 : i32
    %17 = arith.cmpi eq, %arg1, %c0_i32_15 : i32
    %18 = vector.broadcast %17 : i1 to vector<18x1x1xi1>
    %19 = arith.andi %16, %18 : vector<18x1x1xi1>
    %c17_i32 = arith.constant 17 : i32
    %20 = vector.broadcast %c17_i32 : i32 to vector<18x1x1xi32>
    %21 = arith.cmpi eq, %14, %20 : vector<18x1x1xi32>
    %c0_i32_16 = arith.constant 0 : i32
    %22 = arith.cmpi eq, %arg1, %c0_i32_16 : i32
    %23 = vector.broadcast %22 : i1 to vector<18x1x1xi1>
    %24 = arith.andi %21, %23 : vector<18x1x1xi1>
    %25 = arith.ori %19, %24 : vector<18x1x1xi1>
    %cst_17 = arith.constant 0.000000e+00 : f32
    %26 = vector.shape_cast %25 : vector<18x1x1xi1> to vector<18x1x1xi1>
    %27 = vector.broadcast %26 : vector<18x1x1xi1> to vector<18x16x32xi1>
    %28 = vector.broadcast %cst_17 : f32 to vector<18x16x32xf32>
    %29 = arith.select %27, %28, %13 : vector<18x16x32xi1>, vector<18x16x32xf32>
    %30 = tpu.iota {dimensions = array<i32: 1>} : vector<18x16x1xi32>
    %c0_i32_18 = arith.constant 0 : i32
    %31 = vector.broadcast %c0_i32_18 : i32 to vector<18x16x1xi32>
    %32 = arith.cmpi eq, %30, %31 : vector<18x16x1xi32>
    %c1_i32 = arith.constant 1 : i32
    %33 = tpu.dynamic_rotate %29 by %c1_i32 dim 1 : vector<18x16x32xf32>, i32 -> vector<18x16x32xf32>
    %cst_19 = arith.constant 0.000000e+00 : f32
    %34 = vector.shape_cast %32 : vector<18x16x1xi1> to vector<18x16x1xi1>
    %35 = vector.broadcast %34 : vector<18x16x1xi1> to vector<18x16x32xi1>
    %36 = vector.broadcast %cst_19 : f32 to vector<18x16x32xf32>
    %37 = arith.select %35, %36, %33 : vector<18x16x32xi1>, vector<18x16x32xf32>
    %c15_i32 = arith.constant 15 : i32
    %38 = vector.broadcast %c15_i32 : i32 to vector<18x16x1xi32>
    %39 = arith.cmpi eq, %30, %38 : vector<18x16x1xi32>
    %c15_i32_20 = arith.constant 15 : i32
    %40 = tpu.dynamic_rotate %29 by %c15_i32_20 dim 1 : vector<18x16x32xf32>, i32 -> vector<18x16x32xf32>
    %cst_21 = arith.constant 0.000000e+00 : f32
    %41 = vector.shape_cast %39 : vector<18x16x1xi1> to vector<18x16x1xi1>
    %42 = vector.broadcast %41 : vector<18x16x1xi1> to vector<18x16x32xi1>
    %43 = vector.broadcast %cst_21 : f32 to vector<18x16x32xf32>
    %44 = arith.select %42, %43, %40 : vector<18x16x32xi1>, vector<18x16x32xf32>
    %45 = tpu.concatenate %37, %29, %44 in 2 : vector<18x16x32xf32>, vector<18x16x32xf32>, vector<18x16x32xf32> -> vector<18x16x96xf32>
    %46 = arith.truncf %45 : vector<18x16x96xf32> to vector<18x16x96xbf16>
    %c0_22 = arith.constant 0 : index
    %c0_23 = arith.constant 0 : index
    %47 = vector.load %arg8[%c0_22, %c0_23] : memref<1x32xf32, #tpu.memory_space<vmem>>, vector<1x32xf32>
    %48 = vector.shape_cast %47 : vector<1x32xf32> to vector<1x32xf32>
    %49 = vector.broadcast %48 : vector<1x32xf32> to vector<256x32xf32>
    %50 = vector.extract_strided_slice %46 {offsets = [0, 0, 0], sizes = [16, 16, 96], strides = [1, 1, 1]} : vector<18x16x96xbf16> to vector<16x16x96xbf16>
    %51 = vector.shape_cast %50 : vector<16x16x96xbf16> to vector<256x96xbf16>
    %c0_24 = arith.constant 0 : index
    %c0_25 = arith.constant 0 : index
    %c0_26 = arith.constant 0 : index
    %52 = vector.load %arg7[%c0_24, %c0_25, %c0_26] : memref<3x96x32xbf16, #tpu.memory_space<vmem>>, vector<1x96x32xbf16>
    %53 = vector.shape_cast %52 : vector<1x96x32xbf16> to vector<96x32xbf16>
    %cst_27 = arith.constant dense<0.000000e+00> : vector<256x32xf32>
    %54 = tpu.matmul %51, %53, %cst_27 {dimension_numbers = #tpu.dot_dimension_numbers<[1], [0], [0], [1], [0, 0, 1, 1], [], []>} : vector<256x96xbf16>, vector<96x32xbf16>, vector<256x32xf32> -> vector<256x32xf32>
    %55 = arith.addf %49, %54 : vector<256x32xf32>
    %56 = vector.extract_strided_slice %46 {offsets = [1, 0, 0], sizes = [16, 16, 96], strides = [1, 1, 1]} : vector<18x16x96xbf16> to vector<16x16x96xbf16>
    %57 = vector.shape_cast %56 : vector<16x16x96xbf16> to vector<256x96xbf16>
    %c1 = arith.constant 1 : index
    %c0_28 = arith.constant 0 : index
    %c0_29 = arith.constant 0 : index
    %58 = vector.load %arg7[%c1, %c0_28, %c0_29] : memref<3x96x32xbf16, #tpu.memory_space<vmem>>, vector<1x96x32xbf16>
    %59 = vector.shape_cast %58 : vector<1x96x32xbf16> to vector<96x32xbf16>
    %cst_30 = arith.constant dense<0.000000e+00> : vector<256x32xf32>
    %60 = tpu.matmul %57, %59, %cst_30 {dimension_numbers = #tpu.dot_dimension_numbers<[1], [0], [0], [1], [0, 0, 1, 1], [], []>} : vector<256x96xbf16>, vector<96x32xbf16>, vector<256x32xf32> -> vector<256x32xf32>
    %61 = arith.addf %55, %60 : vector<256x32xf32>
    %62 = vector.extract_strided_slice %46 {offsets = [2, 0, 0], sizes = [16, 16, 96], strides = [1, 1, 1]} : vector<18x16x96xbf16> to vector<16x16x96xbf16>
    %63 = vector.shape_cast %62 : vector<16x16x96xbf16> to vector<256x96xbf16>
    %c2 = arith.constant 2 : index
    %c0_31 = arith.constant 0 : index
    %c0_32 = arith.constant 0 : index
    %64 = vector.load %arg7[%c2, %c0_31, %c0_32] : memref<3x96x32xbf16, #tpu.memory_space<vmem>>, vector<1x96x32xbf16>
    %65 = vector.shape_cast %64 : vector<1x96x32xbf16> to vector<96x32xbf16>
    %cst_33 = arith.constant dense<0.000000e+00> : vector<256x32xf32>
    %66 = tpu.matmul %63, %65, %cst_33 {dimension_numbers = #tpu.dot_dimension_numbers<[1], [0], [0], [1], [0, 0, 1, 1], [], []>} : vector<256x96xbf16>, vector<96x32xbf16>, vector<256x32xf32> -> vector<256x32xf32>
    %67 = arith.addf %61, %66 : vector<256x32xf32>
    %68 = vector.shape_cast %67 : vector<256x32xf32> to vector<16x16x32xf32>
    %c0_34 = arith.constant 0 : index
    %c0_35 = arith.constant 0 : index
    %c0_36 = arith.constant 0 : index
    %c0_37 = arith.constant 0 : index
    %69 = vector.load %arg9[%c0_34, %c0_35, %c0_36, %c0_37] : memref<1x16x16x32xf32, #tpu.memory_space<vmem>>, vector<1x16x16x32xf32>
    %70 = vector.shape_cast %69 : vector<1x16x16x32xf32> to vector<16x16x32xf32>
    %71 = vector.shape_cast %68 : vector<16x16x32xf32> to vector<1x16x16x32xf32>
    tpu.vector_store %arg9[%c0_34, %c0_35, %c0_36, %c0_37], %71 {strides = array<i32>} : memref<1x16x16x32xf32, #tpu.memory_space<vmem>>, vector<1x16x16x32xf32>,
    return
  }
  func.func @transform_0(%arg0: i32, %arg1: i32) -> (i32, i32, i32, i32) {
    %c0_i32 = arith.constant 0 : i32
    %c0_i32_0 = arith.constant 0 : i32
    %c0_i32_1 = arith.constant 0 : i32
    return %arg0, %arg1, %c0_i32, %c0_i32_0 : i32, i32, i32, i32
  }
  func.func @transform_1(%arg0: i32, %arg1: i32) -> (i32, i32, i32, i32) {
    %c16_i32 = arith.constant 16 : i32
    %0 = arith.muli %arg1, %c16_i32 : i32
    %c1_i32 = arith.constant 1 : i32
    %1 = arith.subi %0, %c1_i32 : i32
    %c0_i32 = arith.constant 0 : i32
    %2 = arith.maxsi %1, %c0_i32 : i32
    %c0_i32_0 = arith.constant 0 : i32
    %c0_i32_1 = arith.constant 0 : i32
    %c0_i32_2 = arith.constant 0 : i32
    return %arg0, %2, %c0_i32_0, %c0_i32_1 : i32, i32, i32, i32
  }
  func.func @transform_2(%arg0: i32, %arg1: i32) -> (i32, i32, i32, i32) {
    %c16_i32 = arith.constant 16 : i32
    %0 = arith.muli %arg1, %c16_i32 : i32
    %c16_i32_0 = arith.constant 16 : i32
    %1 = arith.addi %0, %c16_i32_0 : i32
    %c15_i32 = arith.constant 15 : i32
    %2 = arith.minsi %1, %c15_i32 : i32
    %c0_i32 = arith.constant 0 : i32
    %c0_i32_1 = arith.constant 0 : i32
    %c0_i32_2 = arith.constant 0 : i32
    return %arg0, %2, %c0_i32, %c0_i32_1 : i32, i32, i32, i32
  }
  func.func @transform_3(%arg0: i32, %arg1: i32) -> (i32, i32) {
    %c0_i32 = arith.constant 0 : i32
    %c0_i32_0 = arith.constant 0 : i32
    %c0_i32_1 = arith.constant 0 : i32
    return %c0_i32, %c0_i32_0 : i32, i32
  }
  func.func @transform_4(%arg0: i32, %arg1: i32) -> (i32, i32) {
    %c0_i32 = arith.constant 0 : i32
    %c0_i32_0 = arith.constant 0 : i32
    %c0_i32_1 = arith.constant 0 : i32
    return %c0_i32, %c0_i32_0 : i32, i32
  }
  func.func @transform_5(%arg0: i32, %arg1: i32) -> (i32, i32, i32) {
    %c0_i32 = arith.constant 0 : i32
    %c0_i32_0 = arith.constant 0 : i32
    %c0_i32_1 = arith.constant 0 : i32
    %c0_i32_2 = arith.constant 0 : i32
    return %c0_i32, %c0_i32_0, %c0_i32_1 : i32, i32, i32
  }
  func.func @transform_6(%arg0: i32, %arg1: i32) -> (i32, i32) {
    %c0_i32 = arith.constant 0 : i32
    %c0_i32_0 = arith.constant 0 : i32
    %c0_i32_1 = arith.constant 0 : i32
    return %c0_i32, %c0_i32_0 : i32, i32
  }
  func.func @transform_7(%arg0: i32, %arg1: i32) -> (i32, i32, i32, i32) {
    %c0_i32 = arith.constant 0 : i32
    %c0_i32_0 = arith.constant 0 : i32
    %c0_i32_1 = arith.constant 0 : i32
    return %arg0, %arg1, %c0_i32, %c0_i32_0 : i32, i32, i32, i32
  }
}

</mosaic_0001>

<bundles_post_ra>
// kernel: tpu_custom_call.1
= control target key start
LH: loop header
LB: loop body
LE: loop exit
PB: predicated region body
PF: predicated region fallthrough
CT: control target
= control target key end

     0   :  { %12 = vsyncpa [#allocation3], 0  ;;  %s4229_s0 = inlined_call_operand.vmem [shape: bf16[2,16,16,4], index: 0, kind: input, shape index: {}]   ;;  %s4230_s1 = inlined_call_operand.vmem [shape: bf16[2,16,16,4], index: 1, kind: input, shape index: {}]   ;;  %s4231_s2 = inlined_call_operand.vmem [shape: bf16[2,16,16,4], index: 2, kind: input, shape index: {}]   ;;  %s4232_s3 = inlined_call_operand.vmem [shape: bf16[4,32], index: 3, kind: input, shape index: {}]   ;;  %s4233_s4 = inlined_call_operand.vmem [shape: f32[1,32], index: 4, kind: input, shape index: {}]   ;;  %s4234_s5 = inlined_call_operand.vmem [shape: bf16[3,96,32], index: 5, kind: input, shape index: {}]   ;;  %s4235_s6 = inlined_call_operand.vmem [shape: f32[1,32], index: 6, kind: input, shape index: {}]   ;;  %s4236_s7 = inlined_call_operand.hbm [shape: f32[2,16,16,32], index: 7, kind: output, shape index: {}]  }
   0x1   :  { %14 = vsyncpa [#allocation3 + $0x1], 0  ;;  %s3326_s24 = smov 0   ;;  %s3328_s25 = smov 0  }
   0x2   :  { %s3330_s26 = smov 0   ;;  %s3332_s27 = smov 0  }
   0x3   :  { %s3334_s28 = smov 0   ;;  %s3336_s29 = smov 0  }
   0x4 LB: > { %s2421_s30 = sadd.s32 4294967295, %s3278_s29   ;;  %s2422_s8 = sadd.s32 4294967294, %s3278_s29   ;;  %s3278_s29 = sphi %s3336_s29, %s20_s29   ;;  %s3274_s28 = sphi %s3334_s28, %s4243_s28   ;;  %s3270_s27 = sphi %s3332_s27, %s4242_s27   ;;  %s3266_s26 = sphi %s3330_s26, %s4241_s26   ;;  %s3262_s25 = sphi %s3328_s25, %s4240_s25   ;;  %s3258_s24 = sphi %s3326_s24, %s4239_s24  }
   0x5   : > { %s32_s9 = sadd.s32 1, %s3274_s28  ;;  %s225_s10 = sadd.s32 1, %s3266_s26 }
   0x6   : > { %p34_p0 = scmp.ge.s32.totalorder %s32_s9, 2  ;;  %p235_p1 = scmp.ne.s32.totalorder %s3266_s26, %s3262_s25 }
   0x7   : > { %p236_p2 = scmp.eq.s32.totalorder %s2421_s30, 1  ;;  %p241_p3 = scmp.ne.s32.totalorder %s3262_s25, %s3258_s24 }
   0x8   : > { %s4245_s9 = smov (%p34_p0, %s32_s9), 0  ;;  %p242_p5 = scmp.eq.s32.totalorder %s2422_s8, 1 }
   0x9   : > { %p3366_p4 = por %p236_p2, %p235_p1  ;;  %s220_s12 = ssub.s32 %s3274_s28, %s4245_s9 }
   0xa   : > { %p2425_p6 = scmp.ge.s32.totalorder %s3278_s29, 1  ;;  %p223_p7 = scmp.eq.s32.totalorder %s220_s12, 0 }
   0xb   : > { %p3373_p8 = por %p242_p5, %p241_p3  ;;  %p326_p9 = scmp.lt.s32.totalorder %s3278_s29, 3 }
   0xc   : > { %s3379_s14 = scalar_select %p223_p7, %s3266_s26, %s225_s10  }
   0xd   : > { %p327_p10 = pnand %p2425_p6, %p326_p9 }
   0xe   : > { %v472_v0 = vld [vmem:[%s4232_s3] sm:$0x3] (!%p327_p10)  ;;  %vm625_vm0 = vcmask (!%p327_p10), 1041408   ;;  %p390_p11 = scmp.lt.s32.totalorder (!%p327_p10), %s3270_s27, 1  ;;  %vm570_vm1 = vcmask (!%p327_p10), 31744   ;;  %v3182_v20 = vld [vmem:[%s4234_s5 + $0x30] sm:$0xff] (!%p327_p10)   ;;  %v848_v22 = vlaneseq (!%p327_p10) }
   0xf   : > { %330 = sbr.rel (%p327_p10) target bundleno = 731 (0x2db), region = 48  ;;  %2923 = vmatprep.subr.msk.bf16.mxu0 (!%p327_p10), %vm625_vm0, %v472_v0  ;;  %v627_v1 = vsel (!%p327_p10), %vm625_vm0, %v472_v0, 0  ;;  %v3183_v21 = vld [vmem:[%s4234_s5 + $0x38] sm:$0xff] (!%p327_p10)   ;;  %2739 = vmatprep.subr.bf16.mxu1 (!%p327_p10), %v3182_v20  ;;  %v3184_v23 = vld [vmem:[%s4234_s5 + $0x40] sm:$0xff] (!%p327_p10)   ;;  %v3185_v26 = vld [vmem:[%s4234_s5 + $0x48] sm:$0xff] (!%p327_p10)   ;;  %s3281_s20 = smov (!%p327_p10), 64  }
  0x10   : > { %2658 = vmatpush3.bf16.msra.mxu0 (!%p327_p10), %v627_v1  ;;  %2740 = vmatpush3.bf16.msra.mxu1 (!%p327_p10), %v3182_v20  ;;  %v3440_v24 = vshrl.u32 (!%p327_p10), %v848_v22, 7  ;;  %v3445_v25 = vld [vmem:[%s4233_s4] ss:$0 sm:$0xff] (!%p327_p10)  ;;  %v3187_v35 = vld [vmem:[%s4234_s5 + $0x50] sm:$0xff] (!%p327_p10)   ;;  %v3188_v47 = vld [vmem:[%s4234_s5 + $0x58] sm:$0xff] (!%p327_p10)   ;;  %vm1369_vm6 = vcmask (!%p327_p10), 261120  }
  0x11   : > { %2741 = vmatprep.subr.bf16.mxu1 (!%p327_p10), %v3183_v21  ;;  %v3186_v27 = vld [vmem:[%s4234_s5] sm:$0xff] (!%p327_p10)   ;;  %vm1406_vm7 = vcmask (!%p327_p10), 523264   ;;  %vm1516_vm8 = vcmask (!%p327_p10), 785408   ;;  %s2570_s22 = sshll.u32 (!%p327_p10), %s3270_s27, 12 }
  0x12   : > { %v3454_v29 = vadd.s32 (!%p327_p10), 8, %v3440_v24  ;;  %2695 = vmatprep.subr.bf16.mxu0 (!%p327_p10), %v3186_v27  ;;  %vm889_vm2 = vcmp.lt.s32.totalorder (!%p327_p10), %v3440_v24, 1  ;;  %vm1004_vm4 = vcmp.lt.s32.totalorder (!%p327_p10), %v3440_v24, 7  ;;  %vm851_vm5 = vcmp.eq.s32.totalorder (!%p327_p10), %v3440_v24, 0  ;;  %s4171_s10 = scalar_lea.hbm (!%p327_p10), %s4236_s7, %s2570_s22 }
  0x14   : > { %2742 = vmatpush3.bf16.msra.mxu1 (!%p327_p10), %v3183_v21  ;;  %vm967_vm3 = vcmp.eq.s32.totalorder (!%p327_p10), %v3454_v29, 15 }
  0x15   : > { %2743 = vmatprep.subr.bf16.mxu1 (!%p327_p10), %v3184_v23 }
  0x16   : > { %s391_s17 = scalar_select %p390_p11, %s3270_s27, 1 }
  0x18   : > { %s2566_s18 = sshll.u32 %s391_s17, 7  ;;  %2744 = vmatpush3.bf16.msra.mxu1 %v3184_v23  ;;  %s3280_s17 = smov 32  }
  0x19   : > { %s3389_s21 = scalar_lea.vmem %s4229_s0, %s2566_s18  ;;  %s412_s30 = scalar_lea.vmem %s4230_s1, %s2566_s18  ;;  %2745 = vmatprep.subr.bf16.mxu1 %v3185_v26 }
  0x1a   : > { %v3164_v2 = vld [vmem:[%s412_s30] sm:$0xff]   ;;  %v3166_v4 = vld [vmem:[%s3389_s21 + $0x8] sm:$0xff]   ;;  %v3167_v5 = vld [vmem:[%s3389_s21 + $0x10] sm:$0xff]   ;;  %s2569_s8 = sadd.s32 120, %s2566_s18  ;;  %s386_s18 = sand.u32 1, %s3262_s25  }
  0x1b   : > { %v3165_v3 = vld [vmem:[%s3389_s21] sm:$0xff]   ;;  %2659 = vmatprep.mubr.msk.bf16.mxu0 %vm570_vm1, %v3164_v2  ;;  %v3168_v6 = vld [vmem:[%s3389_s21 + $0x18] sm:$0xff]   ;;  %s429_s15 = scalar_lea.vmem %s4231_s2, %s2569_s8  ;;  %v3170_v8 = vld [vmem:[%s3389_s21 + $0x28] sm:$0xff]   ;;  %s4183_s27 = scalar_lea.sflag [#allocation3], %s386_s18 }
  0x1c   : > { %2660 = vmatmul.mubr.msk.bf16.vlgmr.msra.gmra.mrb[0].mxu0 %vm570_vm1, %v3165_v3  ;;  %v3169_v7 = vld [vmem:[%s3389_s21 + $0x20] sm:$0xff]   ;;  %v3171_v9 = vld [vmem:[%s3389_s21 + $0x30] sm:$0xff]   ;;  %v3172_v10 = vld [vmem:[%s3389_s21 + $0x38] sm:$0xff]   ;;  %2746 = vmatpush3.bf16.msra.mxu1 %v3185_v26 }
  0x1d   : > { %2663 = vmatprep.mubr.msk.bf16.mxu0 %vm570_vm1, %v3166_v4  ;;  %v3173_v11 = vld [vmem:[%s3389_s21 + $0x40] sm:$0xff]   ;;  %v3174_v12 = vld [vmem:[%s3389_s21 + $0x48] sm:$0xff]   ;;  %v3175_v13 = vld [vmem:[%s3389_s21 + $0x50] sm:$0xff]   ;;  %2696 = vmatpush3.bf16.msra.mxu0 %v3186_v27 }
  0x1e   : > { %v3176_v14 = vld [vmem:[%s3389_s21 + $0x58] sm:$0xff]   ;;  %v3177_v15 = vld [vmem:[%s3389_s21 + $0x60] sm:$0xff]   ;;  %v3178_v16 = vld [vmem:[%s3389_s21 + $0x68] sm:$0xff]   ;;  %2747 = vmatprep.subr.bf16.mxu1 %v3187_v35 }
  0x1f   : > { %v3179_v17 = vld [vmem:[%s3389_s21 + $0x70] sm:$0xff]   ;;  %v3180_v18 = vld [vmem:[%s3389_s21 + $0x78] sm:$0xff]   ;;  %v3181_v19 = vld [vmem:[%s429_s15] sm:$0xff]   ;;  %s3283_s15 = smov [#allocation2]  }
  0x20   : > { %2748 = vmatpush3.bf16.msra.mxu1 %v3187_v35  ;;  %v3490_v2 = vld [vmem:[%s4234_s5 + $0x60] sm:$0xff]   ;;  %v3190_v3 = vld [vmem:[%s4234_s5 + $0x8] sm:$0xff]   ;;  %s3204_s16 = sshll.u32 %s3283_s15, 4  ;;  %s3205_s16 = int_to_ptr.vmem [resolvable:$false] %s3204_s16 }
  0x21   : > { %2749 = vmatprep.subr.bf16.mxu1 %v3188_v47  ;;  %2697 = vmatprep.subr.bf16.mxu0 %v3190_v3  ;;  %s3206_s19 = scalar_lea.vmem %s3205_s16, 8192 }
  0x22   : > { %2698 = vmatpush3.bf16.msra.mxu0 %v3190_v3 }
  0x24   : > { %2664 = vmatmul.mubr.msk.bf16.gmra.mrb[4].mxu0 %vm570_vm1, %v3167_v5  ;;  %2750 = vmatpush3.bf16.msra.mxu1 %v3188_v47 }
  0x25   : > { %2667 = vmatprep.mubr.msk.bf16.mxu0 %vm570_vm1, %v3168_v6  ;;  %2783 = vmatprep.subr.bf16.mxu1 %v3490_v2 }
  0x2c   : > { %2668 = vmatmul.mubr.msk.bf16.gmra.mrb[8].mxu0 %vm570_vm1, %v3169_v7 }
  0x2d   : > { %2671 = vmatprep.mubr.msk.bf16.mxu0 %vm570_vm1, %v3170_v8 }
  0x34   : > { %2672 = vmatmul.mubr.msk.bf16.gmra.mrb[12].mxu0 %vm570_vm1, %v3171_v9 }
  0x35   : > { %2675 = vmatprep.mubr.msk.bf16.mxu0 %vm570_vm1, %v3172_v10 }
  0x3c   : > { %2676 = vmatmul.mubr.msk.bf16.gmra.mrb[16].mxu0 %vm570_vm1, %v3173_v11 }
  0x3d   : > { %2679 = vmatprep.mubr.msk.bf16.mxu0 %vm570_vm1, %v3174_v12 }
  0x44   : > { %2680 = vmatmul.mubr.msk.bf16.gmra.mrb[20].mxu0 %vm570_vm1, %v3175_v13 }
  0x45   : > { %2683 = vmatprep.mubr.msk.bf16.mxu0 %vm570_vm1, %v3176_v14 }
  0x4c   : > { %2684 = vmatmul.mubr.msk.bf16.gmra.mrb[24].mxu0 %vm570_vm1, %v3177_v15 }
  0x4d   : > { %2687 = vmatprep.mubr.msk.bf16.mxu0 %vm570_vm1, %v3178_v16 }
  0x54   : > { %2688 = vmatmul.mubr.msk.bf16.gmra.mrb[28].mxu0 %vm570_vm1, %v3179_v17 }
  0x55   : > { %2691 = vmatprep.mubr.msk.bf16.mxu0 %vm570_vm1, %v3180_v18 }
  0x5c   : > { %2692 = vmatmul.mubr.msk.bf16.gmra.mrb[32].mxu0 %vm570_vm1, %v3181_v19 }
  0xef   : > { %v2661_v28 = vpop.f32.mrb[0].mxu0 }
  0xf0   : > { %v672_v30 = vadd.f32 %v2661_v28, %v3445_v25  ;;  %v663_v31 = vpop.f32.mrb[1].mxu0 }
  0xf1   : > { %v2662_v32 = vpop.f32.mrb[2].mxu0 }
  0xf2   : > { %v675_v33 = vadd.f32 %v2662_v32, %v3445_v25  ;;  %v666_v34 = vpop.f32.mrb[3].mxu0  ;;  %v854_v36 = vrot.slane %v672_v30, 7  ;;  %v969_v37 = vrot.slane %v672_v30, 1 }
  0xf4   : > { %v872_v38 = vrot.slane %v675_v33, 7  ;;  %v987_v39 = vrot.slane %v675_v33, 1  ;;  %v2984_v40 = vpack.i.bf16 %v675_v33, %v672_v30 }
  0xf6   : > { %2985 = vrot.lane.b32.xlu0 %v2984_v40, %s3280_s17  ;;  %v1006_v41 = vsel %vm1004_vm4, %v969_v37, %v987_v39  ;;  %v1024_v42 = vsel %vm1004_vm4, %v987_v39, %v969_v37  ;;  %v3471_v43 = vsel %vm889_vm2, %v854_v36, %v872_v38  ;;  %v3475_v44 = vsel %vm889_vm2, %v872_v38, %v854_v36 }
  0xf7   : > { %v2665_v45 = vpop.f32.mrb[4].mxu0  ;;  %v1048_v46 = vsel %vm967_vm3, 0.0, %v1024_v42 }
  0xf8   : > { %v688_v48 = vadd.f32 %v2665_v45, %v3445_v25  ;;  %v679_v49 = vpop.f32.mrb[5].mxu0  ;;  %v2989_v50 = vpack.i.bf16 %v1048_v46, %v1006_v41 }
  0xf9   : > { %v680_v51 = vadd.f32 %v3445_v25, %v679_v49  ;;  %v2666_v52 = vpop.f32.mrb[6].mxu0 }
  0xfa   : > { %v691_v53 = vadd.f32 %v2666_v52, %v3445_v25  ;;  %2990 = vrot.lane.b32.xlu1 %v2989_v50, %s3281_s20  ;;  %v682_v54 = vpop.f32.mrb[7].mxu0  ;;  %v856_v55 = vrot.slane %v688_v48, 7  ;;  %v971_v56 = vrot.slane %v688_v48, 1 }
  0xfb   : > { %v683_v57 = vadd.f32 %v3445_v25, %v682_v54  ;;  %v855_v58 = vrot.slane %v680_v51, 7  ;;  %v970_v62 = vrot.slane %v680_v51, 1 }
  0xfc   : > { %v874_v59 = vrot.slane %v691_v53, 7  ;;  %v989_v60 = vrot.slane %v691_v53, 1  ;;  %v2999_v61 = vpack.i.bf16 %v691_v53, %v688_v48 }
  0xfd   : > { %v873_v63 = vrot.slane %v683_v57, 7  ;;  %v988_v0 = vrot.slane %v683_v57, 1  ;;  %v2994_v1 = vpack.i.bf16 %v683_v57, %v680_v51 }
  0xfe   : > { %v1008_v4 = vsel %vm1004_vm4, %v971_v56, %v989_v60  ;;  %v1026_v5 = vsel %vm1004_vm4, %v989_v60, %v971_v56  ;;  %v3501_v6 = vsel %vm889_vm2, %v856_v55, %v874_v59  ;;  %v3505_v7 = vsel %vm889_vm2, %v874_v59, %v856_v55  ;;  %v3192_v56 = vld [vmem:[%s4234_s5 + $0x10] sm:$0xff]  }
  0xff   : > { %v2669_v8 = vpop.f32.mrb[8].mxu0  ;;  %2995 = vrot.lane.b32.xlu0 %v2994_v1, %s3280_s17  ;;  %v1007_v9 = vsel %vm1004_vm4, %v970_v62, %v988_v0  ;;  %v1025_v10 = vsel %vm1004_vm4, %v988_v0, %v970_v62  ;;  %v1052_v11 = vsel %vm967_vm3, 0.0, %v1026_v5  ;;  %v3516_v12 = vsel %vm889_vm2, %v855_v58, %v873_v63  ;;  %2699 = vmatprep.subr.bf16.mxu0 %v3192_v56 }
 0x100   : > { %v704_v13 = vadd.f32 %v2669_v8, %v3445_v25  ;;  %v695_v14 = vpop.f32.mrb[9].mxu0  ;;  %v1050_v15 = vsel %vm967_vm3, 0.0, %v1025_v10  ;;  %v3004_v16 = vpack.i.bf16 %v1052_v11, %v1008_v4  ;;  %v3524_v17 = vsel %vm889_vm2, %v873_v63, %v855_v58  ;;  %2700 = vmatpush3.bf16.msra.mxu0 %v3192_v56 }
 0x101   : > { %v696_v18 = vadd.f32 %v3445_v25, %v695_v14  ;;  %v2670_v19 = vpop.f32.mrb[10].mxu0  ;;  %v3009_v20 = vpack.i.bf16 %v1050_v15, %v1007_v9 }
 0x102   : > { %v707_v21 = vadd.f32 %v2670_v19, %v3445_v25  ;;  %v698_v22 = vpop.f32.mrb[11].mxu0  ;;  %v858_v23 = vrot.slane %v704_v13, 7  ;;  %v973_v26 = vrot.slane %v704_v13, 1 }
 0x103   : > { %v699_v27 = vadd.f32 %v3445_v25, %v698_v22  ;;  %3000 = vrot.lane.b32.xlu0 %v2999_v61, %s3280_s17  ;;  %3010 = vrot.lane.b32.xlu1 %v3009_v20, %s3281_s20  ;;  %v857_v28 = vrot.slane %v696_v18, 7  ;;  %v972_v33 = vrot.slane %v696_v18, 1 }
 0x104   : > { %v876_v30 = vrot.slane %v707_v21, 7  ;;  %v991_v31 = vrot.slane %v707_v21, 1  ;;  %v3014_v32 = vpack.i.bf16 %v707_v21, %v704_v13 }
 0x105   : > { %v875_v34 = vrot.slane %v699_v27, 7  ;;  %v990_v35 = vrot.slane %v699_v27, 1  ;;  %v3019_v36 = vpack.i.bf16 %v699_v27, %v696_v18 }
 0x106   : > { %v1010_v37 = vsel %vm1004_vm4, %v973_v26, %v991_v31  ;;  %v1028_v38 = vsel %vm1004_vm4, %v991_v31, %v973_v26  ;;  %v3537_v39 = vsel %vm889_vm2, %v858_v23, %v876_v30  ;;  %v3541_v40 = vsel %vm889_vm2, %v876_v30, %v858_v23 }
 0x107   : > { %v2673_v41 = vpop.f32.mrb[12].mxu0  ;;  %3005 = vrot.lane.b32.xlu0 %v3004_v16, %s3281_s20  ;;  %3020 = vrot.lane.b32.xlu1 %v3019_v36, %s3280_s17  ;;  %v1009_v42 = vsel %vm1004_vm4, %v972_v33, %v990_v35  ;;  %v1027_v45 = vsel %vm1004_vm4, %v990_v35, %v972_v33  ;;  %v1056_v46 = vsel %vm967_vm3, 0.0, %v1028_v38  ;;  %v3553_v47 = vsel %vm889_vm2, %v857_v28, %v875_v34 }
 0x108   : > { %v720_v48 = vadd.f32 %v2673_v41, %v3445_v25  ;;  %v711_v49 = vpop.f32.mrb[13].mxu0  ;;  %v1054_v50 = vsel %vm967_vm3, 0.0, %v1027_v45  ;;  %v3024_v51 = vpack.i.bf16 %v1056_v46, %v1010_v37  ;;  %v3560_v52 = vsel %vm889_vm2, %v875_v34, %v857_v28 }
 0x109   : > { %v712_v53 = vadd.f32 %v3445_v25, %v711_v49  ;;  %v2674_v54 = vpop.f32.mrb[14].mxu0  ;;  %v3029_v55 = vpack.i.bf16 %v1054_v50, %v1009_v42  ;;  %v3194_v49 = vld [vmem:[%s4234_s5 + $0x18] sm:$0xff]  }
 0x10a   : > { %v723_v57 = vadd.f32 %v2674_v54, %v3445_v25  ;;  %v714_v58 = vpop.f32.mrb[15].mxu0  ;;  %v860_v59 = vrot.slane %v720_v48, 7  ;;  %v975_v60 = vrot.slane %v720_v48, 1  ;;  %2701 = vmatprep.subr.bf16.mxu0 %v3194_v49 }
 0x10b   : > { %v715_v61 = vadd.f32 %v3445_v25, %v714_v58  ;;  %3015 = vrot.lane.b32.xlu0 %v3014_v32, %s3280_s17  ;;  %3030 = vrot.lane.b32.xlu1 %v3029_v55, %s3281_s20  ;;  %v859_v62 = vrot.slane %v712_v53, 7  ;;  %v974_v3 = vrot.slane %v712_v53, 1 }
 0x10c   : > { %v878_v63 = vrot.slane %v723_v57, 7  ;;  %v993_v0 = vrot.slane %v723_v57, 1  ;;  %v3034_v1 = vpack.i.bf16 %v723_v57, %v720_v48  ;;  %2702 = vmatpush3.bf16.msra.mxu0 %v3194_v49 }
 0x10d   : > { %v877_v4 = vrot.slane %v715_v61, 7  ;;  %v992_v5 = vrot.slane %v715_v61, 1  ;;  %v3039_v8 = vpack.i.bf16 %v715_v61, %v712_v53 }
 0x10e   : > { %v1012_v9 = vsel %vm1004_vm4, %v975_v60, %v993_v0  ;;  %v1030_v10 = vsel %vm1004_vm4, %v993_v0, %v975_v60  ;;  %v3576_v11 = vsel %vm889_vm2, %v860_v59, %v878_v63  ;;  %v3580_v13 = vsel %vm889_vm2, %v878_v63, %v860_v59 }
 0x10f   : > { %v2677_v14 = vpop.f32.mrb[16].mxu0  ;;  %3025 = vrot.lane.b32.xlu0 %v3024_v51, %s3281_s20  ;;  %3040 = vrot.lane.b32.xlu1 %v3039_v8, %s3280_s17  ;;  %v1011_v15 = vsel %vm1004_vm4, %v974_v3, %v992_v5  ;;  %v1029_v16 = vsel %vm1004_vm4, %v992_v5, %v974_v3  ;;  %v1060_v18 = vsel %vm967_vm3, 0.0, %v1030_v10  ;;  %v3592_v19 = vsel %vm889_vm2, %v859_v62, %v877_v4 }
 0x110   : > { %v736_v20 = vadd.f32 %v2677_v14, %v3445_v25  ;;  %v727_v21 = vpop.f32.mrb[17].mxu0  ;;  %v1058_v22 = vsel %vm967_vm3, 0.0, %v1029_v16  ;;  %v3044_v23 = vpack.i.bf16 %v1060_v18, %v1012_v9  ;;  %v3599_v26 = vsel %vm889_vm2, %v877_v4, %v859_v62 }
 0x111   : > { %v728_v27 = vadd.f32 %v3445_v25, %v727_v21  ;;  %v2678_v28 = vpop.f32.mrb[18].mxu0  ;;  %v3049_v30 = vpack.i.bf16 %v1058_v22, %v1011_v15 }
 0x112   : > { %v739_v31 = vadd.f32 %v2678_v28, %v3445_v25  ;;  %v730_v32 = vpop.f32.mrb[19].mxu0  ;;  %v862_v33 = vrot.slane %v736_v20, 7  ;;  %v977_v34 = vrot.slane %v736_v20, 1 }
 0x113   : > { %v731_v35 = vadd.f32 %v3445_v25, %v730_v32  ;;  %3035 = vrot.lane.b32.xlu0 %v3034_v1, %s3280_s17  ;;  %3050 = vrot.lane.b32.xlu1 %v3049_v30, %s3281_s20  ;;  %v861_v36 = vrot.slane %v728_v27, 7  ;;  %v976_v42 = vrot.slane %v728_v27, 1 }
 0x114   : > { %v880_v37 = vrot.slane %v739_v31, 7  ;;  %v995_v38 = vrot.slane %v739_v31, 1  ;;  %v3054_v41 = vpack.i.bf16 %v739_v31, %v736_v20 }
 0x115   : > { %v879_v45 = vrot.slane %v731_v35, 7  ;;  %v994_v46 = vrot.slane %v731_v35, 1  ;;  %v3059_v48 = vpack.i.bf16 %v731_v35, %v728_v27 }
 0x116   : > { %v1014_v50 = vsel %vm1004_vm4, %v977_v34, %v995_v38  ;;  %v1032_v51 = vsel %vm1004_vm4, %v995_v38, %v977_v34  ;;  %v3615_v53 = vsel %vm889_vm2, %v862_v33, %v880_v37  ;;  %v3619_v54 = vsel %vm889_vm2, %v880_v37, %v862_v33 }
 0x117   : > { %v2681_v55 = vpop.f32.mrb[20].mxu0  ;;  %3045 = vrot.lane.b32.xlu0 %v3044_v23, %s3281_s20  ;;  %3060 = vrot.lane.b32.xlu1 %v3059_v48, %s3280_s17  ;;  %v1013_v56 = vsel %vm1004_vm4, %v976_v42, %v994_v46  ;;  %v1031_v57 = vsel %vm1004_vm4, %v994_v46, %v976_v42  ;;  %v1064_v58 = vsel %vm967_vm3, 0.0, %v1032_v51  ;;  %v3631_v59 = vsel %vm889_vm2, %v861_v36, %v879_v45  ;;  %v3196_v51 = vld [vmem:[%s4234_s5 + $0x20] sm:$0xff]  }
 0x118   : > { %v752_v60 = vadd.f32 %v2681_v55, %v3445_v25  ;;  %v743_v61 = vpop.f32.mrb[21].mxu0  ;;  %v1062_v62 = vsel %vm967_vm3, 0.0, %v1031_v57  ;;  %v3064_v63 = vpack.i.bf16 %v1064_v58, %v1014_v50  ;;  %v3638_v0 = vsel %vm889_vm2, %v879_v45, %v861_v36  ;;  %2703 = vmatprep.subr.bf16.mxu0 %v3196_v51 }
 0x119   : > { %v744_v1 = vadd.f32 %v3445_v25, %v743_v61  ;;  %v2682_v3 = vpop.f32.mrb[22].mxu0  ;;  %v3069_v4 = vpack.i.bf16 %v1062_v62, %v1013_v56  ;;  %2704 = vmatpush3.bf16.msra.mxu0 %v3196_v51 }
 0x11a   : > { %v755_v5 = vadd.f32 %v2682_v3, %v3445_v25  ;;  %v746_v8 = vpop.f32.mrb[23].mxu0  ;;  %v864_v9 = vrot.slane %v752_v60, 7  ;;  %v979_v10 = vrot.slane %v752_v60, 1 }
 0x11b   : > { %v747_v14 = vadd.f32 %v3445_v25, %v746_v8  ;;  %3055 = vrot.lane.b32.xlu0 %v3054_v41, %s3280_s17  ;;  %3070 = vrot.lane.b32.xlu1 %v3069_v4, %s3281_s20  ;;  %v863_v15 = vrot.slane %v744_v1, 7  ;;  %v978_v21 = vrot.slane %v744_v1, 1 }
 0x11c   : > { %v882_v16 = vrot.slane %v755_v5, 7  ;;  %v997_v18 = vrot.slane %v755_v5, 1  ;;  %v3074_v20 = vpack.i.bf16 %v755_v5, %v752_v60 }
 0x11d   : > { %v881_v22 = vrot.slane %v747_v14, 7  ;;  %v996_v23 = vrot.slane %v747_v14, 1  ;;  %v3079_v27 = vpack.i.bf16 %v747_v14, %v744_v1 }
 0x11e   : > { %v1016_v28 = vsel %vm1004_vm4, %v979_v10, %v997_v18  ;;  %v1034_v30 = vsel %vm1004_vm4, %v997_v18, %v979_v10  ;;  %v3651_v31 = vsel %vm889_vm2, %v864_v9, %v882_v16  ;;  %v3655_v32 = vsel %vm889_vm2, %v882_v16, %v864_v9 }
 0x11f   : > { %v2685_v33 = vpop.f32.mrb[24].mxu0  ;;  %3065 = vrot.lane.b32.xlu0 %v3064_v63, %s3281_s20  ;;  %3080 = vrot.lane.b32.xlu1 %v3079_v27, %s3280_s17  ;;  %v1015_v34 = vsel %vm1004_vm4, %v978_v21, %v996_v23  ;;  %v1033_v35 = vsel %vm1004_vm4, %v996_v23, %v978_v21  ;;  %v1068_v36 = vsel %vm967_vm3, 0.0, %v1034_v30  ;;  %v3667_v37 = vsel %vm889_vm2, %v863_v15, %v881_v22 }
 0x120   : > { %v768_v38 = vadd.f32 %v2685_v33, %v3445_v25  ;;  %v759_v41 = vpop.f32.mrb[25].mxu0  ;;  %v1066_v42 = vsel %vm967_vm3, 0.0, %v1033_v35  ;;  %v3084_v45 = vpack.i.bf16 %v1068_v36, %v1016_v28  ;;  %v3674_v46 = vsel %vm889_vm2, %v881_v22, %v863_v15 }
 0x121   : > { %v760_v48 = vadd.f32 %v3445_v25, %v759_v41  ;;  %v2686_v49 = vpop.f32.mrb[26].mxu0  ;;  %v3089_v50 = vpack.i.bf16 %v1066_v42, %v1015_v34 }
 0x122   : > { %v771_v55 = vadd.f32 %v2686_v49, %v3445_v25  ;;  %v762_v56 = vpop.f32.mrb[27].mxu0  ;;  %v866_v57 = vrot.slane %v768_v38, 7  ;;  %v981_v58 = vrot.slane %v768_v38, 1 }
 0x123   : > { %v763_v60 = vadd.f32 %v3445_v25, %v762_v56  ;;  %3075 = vrot.lane.b32.xlu0 %v3074_v20, %s3280_s17  ;;  %3090 = vrot.lane.b32.xlu1 %v3089_v50, %s3281_s20  ;;  %v865_v61 = vrot.slane %v760_v48, 7  ;;  %v980_v3 = vrot.slane %v760_v48, 1 }
 0x124   : > { %v884_v62 = vrot.slane %v771_v55, 7  ;;  %v999_v63 = vrot.slane %v771_v55, 1  ;;  %v3094_v1 = vpack.i.bf16 %v771_v55, %v768_v38 }
 0x125   : > { %v883_v4 = vrot.slane %v763_v60, 7  ;;  %v998_v5 = vrot.slane %v763_v60, 1  ;;  %v3099_v8 = vpack.i.bf16 %v763_v60, %v760_v48 }
 0x126   : > { %v1018_v9 = vsel %vm1004_vm4, %v981_v58, %v999_v63  ;;  %v1036_v10 = vsel %vm1004_vm4, %v999_v63, %v981_v58  ;;  %v3690_v14 = vsel %vm889_vm2, %v866_v57, %v884_v62  ;;  %v3694_v15 = vsel %vm889_vm2, %v884_v62, %v866_v57 }
 0x127   : > { %v2689_v16 = vpop.f32.mrb[28].mxu0  ;;  %3085 = vrot.lane.b32.xlu0 %v3084_v45, %s3281_s20  ;;  %3100 = vrot.lane.b32.xlu1 %v3099_v8, %s3280_s17  ;;  %v1017_v18 = vsel %vm1004_vm4, %v980_v3, %v998_v5  ;;  %v1035_v20 = vsel %vm1004_vm4, %v998_v5, %v980_v3  ;;  %v1072_v21 = vsel %vm967_vm3, 0.0, %v1036_v10  ;;  %v3706_v22 = vsel %vm889_vm2, %v865_v61, %v883_v4 }
 0x128   : > { %v784_v23 = vadd.f32 %v2689_v16, %v3445_v25  ;;  %v775_v27 = vpop.f32.mrb[29].mxu0  ;;  %v1070_v28 = vsel %vm967_vm3, 0.0, %v1035_v20  ;;  %v3104_v30 = vpack.i.bf16 %v1072_v21, %v1018_v9  ;;  %v3713_v33 = vsel %vm889_vm2, %v883_v4, %v865_v61  ;;  %v3198_v61 = vld [vmem:[%s4234_s5 + $0x28] sm:$0xff]  }
 0x129   : > { %v776_v34 = vadd.f32 %v3445_v25, %v775_v27  ;;  %v2690_v35 = vpop.f32.mrb[30].mxu0  ;;  %v3109_v36 = vpack.i.bf16 %v1070_v28, %v1017_v18  ;;  %2705 = vmatprep.subr.bf16.mxu0 %v3198_v61 }
 0x12a   : > { %v787_v38 = vadd.f32 %v2690_v35, %v3445_v25  ;;  %v778_v41 = vpop.f32.mrb[31].mxu0  ;;  %v868_v42 = vrot.slane %v784_v23, 7  ;;  %v983_v45 = vrot.slane %v784_v23, 1  ;;  %2706 = vmatpush3.bf16.msra.mxu0 %v3198_v61 }
 0x12b   : > { %v779_v48 = vadd.f32 %v3445_v25, %v778_v41  ;;  %3095 = vrot.lane.b32.xlu0 %v3094_v1, %s3280_s17  ;;  %3110 = vrot.lane.b32.xlu1 %v3109_v36, %s3281_s20  ;;  %v867_v49 = vrot.slane %v776_v34, 7  ;;  %v982_v56 = vrot.slane %v776_v34, 1  ;;  %v3282_v36 = vmov 0.0  }
 0x12c   : > { %v886_v50 = vrot.slane %v787_v38, 7  ;;  %v1001_v51 = vrot.slane %v787_v38, 1  ;;  %v3114_v55 = vpack.i.bf16 %v787_v38, %v784_v23  ;;  %v968_v38 = vrot.slane %v3282_v36, 1 }
 0x12d   : > { %v885_v57 = vrot.slane %v779_v48, 7  ;;  %v1000_v58 = vrot.slane %v779_v48, 1  ;;  %v3119_v60 = vpack.i.bf16 %v779_v48, %v776_v34 }
 0x12e   : > { %v1020_v62 = vsel %vm1004_vm4, %v983_v45, %v1001_v51  ;;  %v1038_v63 = vsel %vm1004_vm4, %v1001_v51, %v983_v45  ;;  %v3729_v1 = vsel %vm889_vm2, %v868_v42, %v886_v50  ;;  %v3733_v3 = vsel %vm889_vm2, %v886_v50, %v868_v42 }
 0x12f   : > { %v2693_v4 = vpop.f32.mrb[32].mxu0  ;;  %3105 = vrot.lane.b32.xlu0 %v3104_v30, %s3281_s20  ;;  %3120 = vrot.lane.b32.xlu1 %v3119_v60, %s3280_s17  ;;  %v1019_v5 = vsel %vm1004_vm4, %v982_v56, %v1000_v58  ;;  %v1037_v8 = vsel %vm1004_vm4, %v1000_v58, %v982_v56  ;;  %v1076_v9 = vsel %vm967_vm3, 0.0, %v1038_v63  ;;  %v3745_v10 = vsel %vm889_vm2, %v867_v49, %v885_v57 }
 0x130   : > { %v791_v16 = vpop.f32.mrb[33].mxu0  ;;  %v1074_v18 = vsel %vm967_vm3, 0.0, %v1037_v8  ;;  %v3124_v20 = vpack.i.bf16 %v1076_v9, %v1020_v62  ;;  %v3751_v21 = vsel %vm889_vm2, %v885_v57, %v867_v49 }
 0x131   : > { %v792_v23 = vadd.f32 %v3445_v25, %v791_v16  ;;  %v2694_v27 = vpop.f32.mrb[34].mxu0  ;;  %v3129_v28 = vpack.i.bf16 %v1074_v18, %v1019_v5  ;;  %v932_v5 = vsel %vm851_vm5, 0.0, %v3475_v44 }
 0x132   : > { %v794_v30 = vpop.f32.mrb[35].mxu0 }
 0x133   : > { %v795_v34 = vadd.f32 %v3445_v25, %v794_v30  ;;  %3115 = vrot.lane.b32.xlu0 %v3114_v55, %s3280_s17  ;;  %3130 = vrot.lane.b32.xlu1 %v3129_v28, %s3281_s20  ;;  %v869_v35 = vrot.slane %v792_v23, 7  ;;  %v984_v41 = vrot.slane %v792_v23, 1  ;;  %v1046_v55 = vsel %vm967_vm3, 0.0, %v968_v38 }
 0x134   : > { %v3149_v58 = vpack.i.bf16 %v1046_v55, %v968_v38 }
 0x135   : > { %v887_v42 = vrot.slane %v795_v34, 7  ;;  %v1002_v45 = vrot.slane %v795_v34, 1  ;;  %v3134_v48 = vpack.i.bf16 %v795_v34, %v792_v23  ;;  %v934_v34 = vsel %vm851_vm5, 0.0, %v3524_v17  ;;  %v3191_v17 = vld [vmem:[%s4234_s5 + $0x68] sm:$0xff]  }
 0x137   : > { %3125 = vrot.lane.b32.xlu0 %v3124_v20, %s3281_s20  ;;  %3135 = vrot.lane.b32.xlu1 %v3134_v48, %s3280_s17  ;;  %v1021_v49 = vsel %vm1004_vm4, %v984_v41, %v1002_v45  ;;  %v1039_v25 = vsel %vm1004_vm4, %v1002_v45, %v984_v41  ;;  %v3766_v50 = vsel %vm889_vm2, %v869_v35, %v887_v42 }
 0x138   : > { %v1078_v51 = vsel %vm967_vm3, 0.0, %v1039_v25  ;;  %v3774_v56 = vsel %vm889_vm2, %v887_v42, %v869_v35 }
 0x139   : > { %v3139_v57 = vpack.i.bf16 %v1078_v51, %v1021_v49 }
 0x13b   : > { %3140 = vrot.lane.b32.xlu1 %v3139_v57, %s3281_s20  ;;  %3145 = vrot.lane.b32.xlu0 %v3282_v36, %s3280_s17  ;;  %v936_v57 = vsel %vm851_vm5, 0.0, %v3505_v7 }
 0x13f   : > { %3150 = vrot.lane.b32.xlu1 %v3149_v58, %s3281_s20  ;;  %3155 = vrot.lane.b32.xlu0 %v3282_v36, %s3280_s17  ;;  %s2426_s17 = sshll.u32 %s386_s18, 8 }
 0x143   : > { %3160 = vrot.lane.b32.xlu1 %v3149_v58, %s3281_s20  ;;  %s4078_s20 = scalar_lea.vmem [#allocation2], %s2426_s17 }
 0x144   : > { %s2297_s23 = sshll.u32 %s4078_s20, 4  ;;  %s4173_s23 = int_to_ptr.vmem [resolvable:$true] %s2297_s23 }
 0x145   : > { %s3200_s12 = scalar_lea.vmem %s4173_s23, 4096  ;;  %p3207_p1 = scmp.lt.s32.totalorder %s4173_s23, %s3205_s16 }
 0x146   : > { %p3201_p12 = scmp.ne.s32.totalorder %s4173_s23, %s3200_s12  ;;  %p3208_p2 = scmp.lt.s32.totalorder %s3206_s19, %s3200_s12 }
 0x148   : > { %p3202_p13 = pnand %p3201_p12, %p3366_p4  ;;  %p3209_p3 = por %p3208_p2, %p3207_p1 }
 0x14a   : > { %p3203_p0 = pneg %p3202_p13 }
 0x14c   : > { %p3210_p5 = pnand %p3209_p3, %p3203_p0 }
 0x168   : > { %v2986_v29 = vpop.permute.xlu0 %2985 }
 0x169   : > { %v2988_v60 = vunpack.i.h.bf16 %v2986_v29  ;;  %v2987_v61 = vunpack.i.l.bf16 %v2986_v29 }
 0x16b   : > { %v1372_v8 = vsel %vm1369_vm6, %v932_v5, %v2987_v61  ;;  %v1373_v9 = vsel %vm1369_vm6, %v3471_v43, %v2988_v60 }
 0x16c   : > { %v2991_v62 = vpop.permute.xlu1 %2990 }
 0x16d   : > { %v2993_v63 = vunpack.i.h.bf16 %v2991_v62  ;;  %v2992_v4 = vunpack.i.l.bf16 %v2991_v62 }
 0x16f   : > { %v1409_v16 = vsel %vm1406_vm7, %v1372_v8, %v2992_v4  ;;  %v1410_v18 = vsel %vm1406_vm7, %v1373_v9, %v2993_v63  ;;  %v938_v9 = vsel %vm851_vm5, 0.0, %v3560_v52 }
 0x170   : > { %v3792_v20 = vpack.c.bf16 %v1410_v18, %v1409_v16 }
 0x171   : > { %v2996_v23 = vpop.permute.xlu0 %2995 }
 0x172   : > { %2751 = vmatprep.mubr.msk.bf16.mxu1 %vm1516_vm8, %v3792_v20  ;;  %v2998_v27 = vunpack.i.h.bf16 %v2996_v23  ;;  %v2997_v28 = vunpack.i.l.bf16 %v2996_v23 }
 0x174   : > { %v1374_v38 = vsel %vm1369_vm6, %v934_v34, %v2997_v28  ;;  %v1375_v41 = vsel %vm1369_vm6, %v3516_v12, %v2998_v27 }
 0x175   : > { %v3001_v30 = vpop.permute.xlu0 %3000  ;;  %v3011_v44 = vpop.permute.xlu1 %3010 }
 0x176   : > { %v3013_v43 = vunpack.i.h.bf16 %v3011_v44  ;;  %v3012_v35 = vunpack.i.l.bf16 %v3011_v44  ;;  %v3003_v42 = vunpack.i.h.bf16 %v3001_v30  ;;  %v3002_v45 = vunpack.i.l.bf16 %v3001_v30 }
 0x178   : > { %v1411_v48 = vsel %vm1406_vm7, %v1374_v38, %v3012_v35  ;;  %v1412_v49 = vsel %vm1406_vm7, %v1375_v41, %v3013_v43  ;;  %v1377_v29 = vsel %vm1369_vm6, %v3501_v6, %v3003_v42  ;;  %v1376_v60 = vsel %vm1369_vm6, %v936_v57, %v3002_v45  ;;  %v3193_v6 = vld [vmem:[%s4234_s5 + $0x70] sm:$0xff]  }
 0x179   : > { %v3804_v25 = vpack.c.bf16 %v1412_v49, %v1411_v48  ;;  %v3006_v51 = vpop.permute.xlu0 %3005  ;;  %v3021_v55 = vpop.permute.xlu1 %3020  ;;  %v940_v35 = vsel %vm851_vm5, 0.0, %v3541_v40 }
 0x17a   : > { %v3008_v58 = vunpack.i.h.bf16 %v3006_v51  ;;  %v3007_v12 = vunpack.i.l.bf16 %v3006_v51  ;;  %v3023_v61 = vunpack.i.h.bf16 %v3021_v55  ;;  %v3022_v62 = vunpack.i.l.bf16 %v3021_v55 }
 0x17b   : > { %2752 = vmatmul.mubr.msk.bf16.vlgmr.msra.gmra.mrb[0].mxu1 %vm1516_vm8, %v3804_v25 }
 0x17c   : > { %v1413_v63 = vsel %vm1406_vm7, %v1376_v60, %v3007_v12  ;;  %v1414_v4 = vsel %vm1406_vm7, %v1377_v29, %v3008_v58  ;;  %2784 = vmatpush3.bf16.msra.mxu1 %v3490_v2  ;;  %v1379_v23 = vsel %vm1369_vm6, %v3553_v47, %v3023_v61  ;;  %v1378_v2 = vsel %vm1369_vm6, %v938_v9, %v3022_v62  ;;  %v3195_v47 = vld [vmem:[%s4234_s5 + $0x78] sm:$0xff]  }
 0x17d   : > { %v3820_v5 = vpack.c.bf16 %v1414_v4, %v1413_v63  ;;  %v3016_v7 = vpop.permute.xlu0 %3015  ;;  %v3031_v8 = vpop.permute.xlu1 %3030  ;;  %2785 = vmatprep.subr.bf16.mxu1 %v3191_v17  ;;  %v942_v58 = vsel %vm851_vm5, 0.0, %v3599_v26  ;;  %v944_v9 = vsel %vm851_vm5, 0.0, %v3580_v13 }
 0x17e   : > { %v3033_v16 = vunpack.i.h.bf16 %v3031_v8  ;;  %v3032_v18 = vunpack.i.l.bf16 %v3031_v8  ;;  %v3018_v27 = vunpack.i.h.bf16 %v3016_v7  ;;  %v3017_v28 = vunpack.i.l.bf16 %v3016_v7 }
 0x17f   : > { %2755 = vmatprep.mubr.msk.bf16.mxu1 %vm1516_vm8, %v3820_v5 }
 0x180   : > { %v1415_v30 = vsel %vm1406_vm7, %v1378_v2, %v3032_v18  ;;  %v1416_v44 = vsel %vm1406_vm7, %v1379_v23, %v3033_v16  ;;  %2786 = vmatpush3.bf16.msra.mxu1 %v3191_v17  ;;  %v1381_v42 = vsel %vm1369_vm6, %v3537_v39, %v3018_v27  ;;  %v1380_v45 = vsel %vm1369_vm6, %v940_v35, %v3017_v28  ;;  %v3197_v39 = vld [vmem:[%s4234_s5 + $0x80] sm:$0xff]  }
 0x181   : > { %v3835_v34 = vpack.c.bf16 %v1416_v44, %v1415_v30  ;;  %v3026_v52 = vpop.permute.xlu0 %3025  ;;  %v3041_v43 = vpop.permute.xlu1 %3040  ;;  %2787 = vmatprep.subr.bf16.mxu1 %v3193_v6 }
 0x182   : > { %v3028_v38 = vunpack.i.h.bf16 %v3026_v52  ;;  %v3027_v41 = vunpack.i.l.bf16 %v3026_v52  ;;  %v3043_v48 = vunpack.i.h.bf16 %v3041_v43  ;;  %v3042_v49 = vunpack.i.l.bf16 %v3041_v43 }
 0x183   : > { %2756 = vmatmul.mubr.msk.bf16.gmra.mrb[4].mxu1 %vm1516_vm8, %v3835_v34 }
 0x184   : > { %v1417_v51 = vsel %vm1406_vm7, %v1380_v45, %v3027_v41  ;;  %v1418_v55 = vsel %vm1406_vm7, %v1381_v42, %v3028_v38  ;;  %2788 = vmatpush3.bf16.msra.mxu1 %v3193_v6  ;;  %v1383_v60 = vsel %vm1369_vm6, %v3592_v19, %v3043_v48  ;;  %v1382_v61 = vsel %vm1369_vm6, %v942_v58, %v3042_v49  ;;  %v3199_v19 = vld [vmem:[%s4234_s5 + $0x88] sm:$0xff]  }
 0x185   : > { %v3850_v17 = vpack.c.bf16 %v1418_v55, %v1417_v51  ;;  %v3036_v40 = vpop.permute.xlu0 %3035  ;;  %v3051_v57 = vpop.permute.xlu1 %3050  ;;  %2789 = vmatprep.subr.bf16.mxu1 %v3195_v47 }
 0x186   : > { %v3053_v12 = vunpack.i.h.bf16 %v3051_v57  ;;  %v3052_v29 = vunpack.i.l.bf16 %v3051_v57  ;;  %v3038_v62 = vunpack.i.h.bf16 %v3036_v40  ;;  %v3037_v63 = vunpack.i.l.bf16 %v3036_v40 }
 0x187   : > { %2759 = vmatprep.mubr.msk.bf16.mxu1 %vm1516_vm8, %v3850_v17 }
 0x188   : > { %v1419_v4 = vsel %vm1406_vm7, %v1382_v61, %v3052_v29  ;;  %v1420_v7 = vsel %vm1406_vm7, %v1383_v60, %v3053_v12  ;;  %2790 = vmatpush3.bf16.msra.mxu1 %v3195_v47  ;;  %v1385_v23 = vsel %vm1369_vm6, %v3576_v11, %v3038_v62  ;;  %v1384_v2 = vsel %vm1369_vm6, %v944_v9, %v3037_v63 }
 0x189   : > { %v3865_v8 = vpack.c.bf16 %v1420_v7, %v1419_v4  ;;  %v3046_v26 = vpop.permute.xlu0 %3045  ;;  %v3061_v6 = vpop.permute.xlu1 %3060  ;;  %2791 = vmatprep.subr.bf16.mxu1 %v3197_v39  ;;  %v946_v11 = vsel %vm851_vm5, 0.0, %v3638_v0  ;;  %v950_v4 = vsel %vm851_vm5, 0.0, %v3674_v46 }
 0x18a   : > { %v3048_v16 = vunpack.i.h.bf16 %v3046_v26  ;;  %v3047_v18 = vunpack.i.l.bf16 %v3046_v26  ;;  %v3063_v27 = vunpack.i.h.bf16 %v3061_v6  ;;  %v3062_v28 = vunpack.i.l.bf16 %v3061_v6 }
 0x18b   : > { %2760 = vmatmul.mubr.msk.bf16.gmra.mrb[8].mxu1 %vm1516_vm8, %v3865_v8 }
 0x18c   : > { %v1421_v30 = vsel %vm1406_vm7, %v1384_v2, %v3047_v18  ;;  %v1422_v44 = vsel %vm1406_vm7, %v1385_v23, %v3048_v16  ;;  %2792 = vmatpush3.bf16.msra.mxu1 %v3197_v39  ;;  %v1387_v38 = vsel %vm1369_vm6, %v3631_v59, %v3063_v27  ;;  %v1386_v41 = vsel %vm1369_vm6, %v946_v11, %v3062_v28 }
 0x18d   : > { %v3880_v52 = vpack.c.bf16 %v1422_v44, %v1421_v30  ;;  %v3056_v13 = vpop.permute.xlu0 %3055  ;;  %v3071_v43 = vpop.permute.xlu1 %3070  ;;  %2793 = vmatprep.subr.bf16.mxu1 %v3199_v19  ;;  %v948_v59 = vsel %vm851_vm5, 0.0, %v3619_v54  ;;  %v952_v27 = vsel %vm851_vm5, 0.0, %v3655_v32 }
 0x18e   : > { %v3073_v47 = vunpack.i.h.bf16 %v3071_v43  ;;  %v3072_v35 = vunpack.i.l.bf16 %v3071_v43  ;;  %v3058_v42 = vunpack.i.h.bf16 %v3056_v13  ;;  %v3057_v45 = vunpack.i.l.bf16 %v3056_v13 }
 0x18f   : > { %2763 = vmatprep.mubr.msk.bf16.mxu1 %vm1516_vm8, %v3880_v52 }
 0x190   : > { %v1423_v48 = vsel %vm1406_vm7, %v1386_v41, %v3072_v35  ;;  %v1424_v49 = vsel %vm1406_vm7, %v1387_v38, %v3073_v47  ;;  %2794 = vmatpush3.bf16.msra.mxu1 %v3199_v19  ;;  %v1389_v39 = vsel %vm1369_vm6, %v3615_v53, %v3058_v42  ;;  %v1388_v58 = vsel %vm1369_vm6, %v948_v59, %v3057_v45 }
 0x191   : > { %v3892_v51 = vpack.c.bf16 %v1424_v49, %v1423_v48  ;;  %v3066_v0 = vpop.permute.xlu0 %3065  ;;  %v3081_v55 = vpop.permute.xlu1 %3080  ;;  %v954_v41 = vsel %vm851_vm5, 0.0, %v3713_v33 }
 0x192   : > { %v3068_v40 = vunpack.i.h.bf16 %v3066_v0  ;;  %v3067_v57 = vunpack.i.l.bf16 %v3066_v0  ;;  %v3083_v12 = vunpack.i.h.bf16 %v3081_v55  ;;  %v3082_v29 = vunpack.i.l.bf16 %v3081_v55 }
 0x193   : > { %2764 = vmatmul.mubr.msk.bf16.gmra.mrb[12].mxu1 %vm1516_vm8, %v3892_v51 }
 0x194   : > { %v1425_v60 = vsel %vm1406_vm7, %v1388_v58, %v3067_v57  ;;  %v1426_v61 = vsel %vm1406_vm7, %v1389_v39, %v3068_v40  ;;  %v1391_v26 = vsel %vm1369_vm6, %v3667_v37, %v3083_v12  ;;  %v1390_v6 = vsel %vm1369_vm6, %v950_v4, %v3082_v29 }
 0x195   : > { %v3904_v62 = vpack.c.bf16 %v1426_v61, %v1425_v60  ;;  %v3076_v63 = vpop.permute.xlu0 %3075  ;;  %v3091_v54 = vpop.permute.xlu1 %3090  ;;  %v956_v39 = vsel %vm851_vm5, 0.0, %v3694_v15 }
 0x196   : > { %v3093_v53 = vunpack.i.h.bf16 %v3091_v54  ;;  %v3092_v7 = vunpack.i.l.bf16 %v3091_v54  ;;  %v3078_v19 = vunpack.i.h.bf16 %v3076_v63  ;;  %v3077_v9 = vunpack.i.l.bf16 %v3076_v63 }
 0x197   : > { %2767 = vmatprep.mubr.msk.bf16.mxu1 %vm1516_vm8, %v3904_v62 }
 0x198   : > { %v1427_v16 = vsel %vm1406_vm7, %v1390_v6, %v3092_v7  ;;  %v1428_v18 = vsel %vm1406_vm7, %v1391_v26, %v3093_v53  ;;  %v1393_v30 = vsel %vm1369_vm6, %v3651_v31, %v3078_v19  ;;  %v1392_v44 = vsel %vm1369_vm6, %v952_v27, %v3077_v9 }
 0x199   : > { %v3916_v23 = vpack.c.bf16 %v1428_v18, %v1427_v16  ;;  %v3086_v2 = vpop.permute.xlu0 %3085  ;;  %v3101_v46 = vpop.permute.xlu1 %3100  ;;  %v958_v7 = vsel %vm851_vm5, 0.0, %v3751_v21 }
 0x19a   : > { %v3088_v37 = vunpack.i.h.bf16 %v3086_v2  ;;  %v3087_v28 = vunpack.i.l.bf16 %v3086_v2  ;;  %v3103_v13 = vunpack.i.h.bf16 %v3101_v46  ;;  %v3102_v43 = vunpack.i.l.bf16 %v3101_v46 }
 0x19b   : > { %2768 = vmatmul.mubr.msk.bf16.gmra.mrb[16].mxu1 %vm1516_vm8, %v3916_v23 }
 0x19c   : > { %v1429_v11 = vsel %vm1406_vm7, %v1392_v44, %v3087_v28  ;;  %v1430_v47 = vsel %vm1406_vm7, %v1393_v30, %v3088_v37  ;;  %v1395_v45 = vsel %vm1369_vm6, %v3706_v22, %v3103_v13  ;;  %v1394_v48 = vsel %vm1369_vm6, %v954_v41, %v3102_v43 }
 0x19d   : > { %v3928_v35 = vpack.c.bf16 %v1430_v47, %v1429_v11  ;;  %v3096_v38 = vpop.permute.xlu0 %3095  ;;  %v3111_v32 = vpop.permute.xlu1 %3110  ;;  %v3967_v37 = vrot.slane %v3282_v36, 7 }
 0x19e   : > { %v3113_v31 = vunpack.i.h.bf16 %v3111_v32  ;;  %v3112_v42 = vunpack.i.l.bf16 %v3111_v32  ;;  %v3098_v49 = vunpack.i.h.bf16 %v3096_v38  ;;  %v3097_v0 = vunpack.i.l.bf16 %v3096_v38 }
 0x19f   : > { %2771 = vmatprep.mubr.msk.bf16.mxu1 %vm1516_vm8, %v3928_v35 }
 0x1a0   : > { %v1431_v55 = vsel %vm1406_vm7, %v1394_v48, %v3112_v42  ;;  %v1432_v59 = vsel %vm1406_vm7, %v1395_v45, %v3113_v31  ;;  %v1397_v12 = vsel %vm1369_vm6, %v3690_v14, %v3098_v49  ;;  %v1396_v29 = vsel %vm1369_vm6, %v956_v39, %v3097_v0 }
 0x1a1   : > { %v3940_v40 = vpack.c.bf16 %v1432_v59, %v1431_v55  ;;  %v3106_v57 = vpop.permute.xlu0 %3105  ;;  %v3121_v33 = vpop.permute.xlu1 %3120 }
 0x1a2   : > { %v3108_v22 = vunpack.i.h.bf16 %v3106_v57  ;;  %v3107_v58 = vunpack.i.l.bf16 %v3106_v57  ;;  %v3123_v60 = vunpack.i.h.bf16 %v3121_v33  ;;  %v3122_v61 = vunpack.i.l.bf16 %v3121_v33 }
 0x1a3   : > { %2772 = vmatmul.mubr.msk.bf16.gmra.mrb[20].mxu1 %vm1516_vm8, %v3940_v40 }
 0x1a4   : > { %v1433_v63 = vsel %vm1406_vm7, %v1396_v29, %v3107_v58  ;;  %v1434_v54 = vsel %vm1406_vm7, %v1397_v12, %v3108_v22  ;;  %v1399_v6 = vsel %vm1369_vm6, %v3745_v10, %v3123_v60  ;;  %v1398_v19 = vsel %vm1369_vm6, %v958_v7, %v3122_v61 }
 0x1a5   : > { %v3952_v4 = vpack.c.bf16 %v1434_v54, %v1433_v63  ;;  %v3116_v53 = vpop.permute.xlu0 %3115  ;;  %v3131_v15 = vpop.permute.xlu1 %3130  ;;  %v960_v10 = vsel %vm851_vm5, 0.0, %v3733_v3  ;;  %v962_v3 = vsel %vm851_vm5, 0.0, %v3774_v56 }
 0x1a6   : > { %v3133_v14 = vunpack.i.h.bf16 %v3131_v15  ;;  %v3132_v26 = vunpack.i.l.bf16 %v3131_v15  ;;  %v3118_v9 = vunpack.i.h.bf16 %v3116_v53  ;;  %v3117_v16 = vunpack.i.l.bf16 %v3116_v53 }
 0x1a7   : > { %2775 = vmatprep.mubr.msk.bf16.mxu1 %vm1516_vm8, %v3952_v4 }
 0x1a8   : > { %v1435_v18 = vsel %vm1406_vm7, %v1398_v19, %v3132_v26  ;;  %v1436_v2 = vsel %vm1406_vm7, %v1399_v6, %v3133_v14  ;;  %v1401_v44 = vsel %vm1369_vm6, %v3729_v1, %v3118_v9  ;;  %v1400_v13 = vsel %vm1369_vm6, %v960_v10, %v3117_v16 }
 0x1a9   : > { %v3964_v46 = vpack.c.bf16 %v1436_v2, %v1435_v18  ;;  %v3126_v27 = vpop.permute.xlu0 %3125  ;;  %v3136_v21 = vpop.permute.xlu1 %3135  ;;  %v930_v1 = vsel %vm851_vm5, 0.0, %v3967_v37 }
 0x1aa   : > { %v3128_v28 = vunpack.i.h.bf16 %v3126_v27  ;;  %v3127_v30 = vunpack.i.l.bf16 %v3126_v27  ;;  %v3138_v43 = vunpack.i.h.bf16 %v3136_v21  ;;  %v3137_v11 = vunpack.i.l.bf16 %v3136_v21 }
 0x1ab   : > { %2776 = vmatmul.mubr.msk.bf16.gmra.mrb[24].mxu1 %vm1516_vm8, %v3964_v46 }
 0x1ac   : > { %v1437_v47 = vsel %vm1406_vm7, %v1400_v13, %v3127_v30  ;;  %v1438_v36 = vsel %vm1406_vm7, %v1401_v44, %v3128_v28  ;;  %v1403_v49 = vsel %vm1369_vm6, %v3766_v50, %v3138_v43  ;;  %v1402_v0 = vsel %vm1369_vm6, %v962_v3, %v3137_v11 }
 0x1ad   : > { %v3979_v38 = vpack.c.bf16 %v1438_v36, %v1437_v47  ;;  %v3141_v32 = vpop.permute.xlu1 %3140  ;;  %v3146_v41 = vpop.permute.xlu0 %3145 }
 0x1ae   : > { %v3143_v31 = vunpack.i.h.bf16 %v3141_v32  ;;  %v3142_v42 = vunpack.i.l.bf16 %v3141_v32  ;;  %v3148_v45 = vunpack.i.h.bf16 %v3146_v41  ;;  %v3147_v48 = vunpack.i.l.bf16 %v3146_v41 }
 0x1af   : > { %2779 = vmatprep.mubr.msk.bf16.mxu1 %vm1516_vm8, %v3979_v38 }
 0x1b0   : > { %v1439_v56 = vsel %vm1406_vm7, %v1402_v0, %v3142_v42  ;;  %v1440_v55 = vsel %vm1406_vm7, %v1403_v49, %v3143_v31  ;;  %v1371_v24 = vsel %vm1369_vm6, %v3967_v37, %v3148_v45  ;;  %v1370_v57 = vsel %vm1369_vm6, %v930_v1, %v3147_v48 }
 0x1b1   : > { %v1459_v59 = vpack.c.bf16 %v1440_v55, %v1439_v56  ;;  %v3151_v33 = vpop.permute.xlu1 %3150 }
 0x1b2   : > { %v3153_v39 = vunpack.i.h.bf16 %v3151_v33  ;;  %v3152_v22 = vunpack.i.l.bf16 %v3151_v33 }
 0x1b3   : > { %2780 = vmatmul.mubr.msk.bf16.gmra.mrb[28].mxu1 %vm1516_vm8, %v1459_v59 }
 0x1b4   : > { %v1408_v50 = vsel %vm1406_vm7, %v1371_v24, %v3153_v39  ;;  %v1407_v58 = vsel %vm1406_vm7, %v1370_v57, %v3152_v22  ;;  %2795 = vmatprep.mubr.msk.bf16.mxu1 %vm1516_vm8, %v3804_v25 }
 0x1b5   : > { %v1443_v12 = vpack.c.bf16 %v1408_v50, %v1407_v58 }
 0x1b7   : > { %2707 = vmatprep.mubr.msk.bf16.mxu0 %vm1516_vm8, %v1443_v12 }
 0x1b8   : > { %2708 = vmatmul.mubr.msk.bf16.vlgmr.msra.gmra.mrb[36].mxu0 %vm1516_vm8, %v3792_v20  ;;  %v3156_v20 = vpop.permute.xlu0 %3155 }
 0x1b9   : > { %2711 = vmatprep.mubr.msk.bf16.mxu0 %vm1516_vm8, %v3804_v25  ;;  %v3158_v25 = vunpack.i.h.bf16 %v3156_v20 }
 0x1bb   : > { %2796 = vmatmul.mubr.msk.bf16.vlgmr.msra.gmra.mrb[0].mxu1 %vm1516_vm8, %v3820_v5 }
 0x1bc   : > { %2799 = vmatprep.mubr.msk.bf16.mxu1 %vm1516_vm8, %v3835_v34 }
 0x1c0   : > { %2712 = vmatmul.mubr.msk.bf16.gmra.mrb[40].mxu0 %vm1516_vm8, %v3820_v5  ;;  %v3157_v5 = vunpack.i.l.bf16 %v3156_v20 }
 0x1c1   : > { %2715 = vmatprep.mubr.msk.bf16.mxu0 %vm1516_vm8, %v3835_v34  ;;  %v3161_v34 = vpop.permute.xlu1 %3160 }
 0x1c3   : > { %2800 = vmatmul.mubr.msk.bf16.gmra.mrb[4].mxu1 %vm1516_vm8, %v3850_v17 }
 0x1c4   : > { %2803 = vmatprep.mubr.msk.bf16.mxu1 %vm1516_vm8, %v3865_v8 }
 0x1c8   : > { %2716 = vmatmul.mubr.msk.bf16.gmra.mrb[44].mxu0 %vm1516_vm8, %v3850_v17  ;;  %v3163_v17 = vunpack.i.h.bf16 %v3161_v34 }
 0x1c9   : > { %2719 = vmatprep.mubr.msk.bf16.mxu0 %vm1516_vm8, %v3865_v8  ;;  %v3162_v8 = vunpack.i.l.bf16 %v3161_v34 }
 0x1cb   : > { %2804 = vmatmul.mubr.msk.bf16.gmra.mrb[8].mxu1 %vm1516_vm8, %v3880_v52 }
 0x1cc   : > { %2807 = vmatprep.mubr.msk.bf16.mxu1 %vm1516_vm8, %v3892_v51 }
 0x1d0   : > { %2720 = vmatmul.mubr.msk.bf16.gmra.mrb[48].mxu0 %vm1516_vm8, %v3880_v52  ;;  %v1405_v52 = vsel %vm1369_vm6, %v3967_v37, %v3158_v25 }
 0x1d1   : > { %2723 = vmatprep.mubr.msk.bf16.mxu0 %vm1516_vm8, %v3892_v51  ;;  %v1404_v51 = vsel %vm1369_vm6, %v930_v1, %v3157_v5 }
 0x1d3   : > { %2808 = vmatmul.mubr.msk.bf16.gmra.mrb[12].mxu1 %vm1516_vm8, %v3904_v62 }
 0x1d4   : > { %2811 = vmatprep.mubr.msk.bf16.mxu1 %vm1516_vm8, %v3916_v23 }
 0x1d8   : > { %2724 = vmatmul.mubr.msk.bf16.gmra.mrb[52].mxu0 %vm1516_vm8, %v3904_v62  ;;  %v1442_v62 = vsel %vm1406_vm7, %v1405_v52, %v3163_v17 }
 0x1d9   : > { %2727 = vmatprep.mubr.msk.bf16.mxu0 %vm1516_vm8, %v3916_v23  ;;  %v1441_v23 = vsel %vm1406_vm7, %v1404_v51, %v3162_v8 }
 0x1db   : > { %2812 = vmatmul.mubr.msk.bf16.gmra.mrb[16].mxu1 %vm1516_vm8, %v3928_v35 }
 0x1dc   : > { %2815 = vmatprep.mubr.msk.bf16.mxu1 %vm1516_vm8, %v3940_v40 }
 0x1e0   : > { %2728 = vmatmul.mubr.msk.bf16.gmra.mrb[56].mxu0 %vm1516_vm8, %v3928_v35  ;;  %v1460_v35 = vpack.c.bf16 %v1442_v62, %v1441_v23 }
 0x1e1   : > { %2731 = vmatprep.mubr.msk.bf16.mxu0 %vm1516_vm8, %v3940_v40  ;;  %v4070_v40 = vld [vmem:[%s4235_s6] ss:$0 sm:$0xff] }
 0x1e3   : > { %2816 = vmatmul.mubr.msk.bf16.gmra.mrb[20].mxu1 %vm1516_vm8, %v3952_v4 }
 0x1e4   : > { %2819 = vmatprep.mubr.msk.bf16.mxu1 %vm1516_vm8, %v3964_v46 }
 0x1e8   : > { %2732 = vmatmul.mubr.msk.bf16.gmra.mrb[60].mxu0 %vm1516_vm8, %v3952_v4 }
 0x1e9   : > { %2735 = vmatprep.mubr.msk.bf16.mxu0 %vm1516_vm8, %v3964_v46 }
 0x1eb   : > { %2820 = vmatmul.mubr.msk.bf16.gmra.mrb[24].mxu1 %vm1516_vm8, %v3979_v38 }
 0x1ec   : > { %2823 = vmatprep.mubr.msk.bf16.mxu1 %vm1516_vm8, %v1459_v59 }
 0x1f0   : > { %2736 = vmatmul.mubr.msk.bf16.gmra.mrb[64].mxu0 %vm1516_vm8, %v3979_v38 }
 0x1f3   : > { %2824 = vmatmul.mubr.msk.bf16.gmra.mrb[28].mxu1 %vm1516_vm8, %v1460_v35 }
 0x28b   : > { %v2709_v29 = vpop.f32.mrb[36].mxu0 }
 0x28c   : > { %v1728_v60 = vadd.f32 %v2709_v29, %v4070_v40  ;;  %v1599_v61 = vpop.f32.mrb[37].mxu0 }
 0x28d   : > { %v1726_v63 = vadd.f32 %v4070_v40, %v1599_v61  ;;  %v2710_v54 = vpop.f32.mrb[38].mxu0 }
 0x28e   : > { %v1729_v4 = vadd.f32 %v2710_v54, %v4070_v40  ;;  %v1602_v53 = vpop.f32.mrb[39].mxu0  ;;  %v2797_v15 = vpop.f32.mrb[0].mxu1 }
 0x28f   : > { %v1727_v7 = vadd.f32 %v4070_v40, %v1602_v53  ;;  %v2828_v14 = vadd.f32 %v2797_v15, %v1728_v60  ;;  %v2089_v26 = vpop.f32.mrb[1].mxu1 }
 0x290   : > { %v2830_v6 = vadd.f32 %v2089_v26, %v1726_v63  ;;  %v2798_v19 = vpop.f32.mrb[2].mxu1 }
 0x291   : > { %2250 = vst.msk [vmem:[%s4078_s20 + $0x10] sm:$0xff] %vm1369_vm6, %v2828_v14  ;;  %v2832_v9 = vadd.f32 %v2798_v19, %v1729_v4  ;;  %v2092_v16 = vpop.f32.mrb[3].mxu1 }
 0x292   : > { %2248 = vst.msk [vmem:[%s4078_s20] sm:$0xff] %vm1369_vm6, %v2830_v6  ;;  %v2834_v18 = vadd.f32 %v2092_v16, %v1727_v7 }
 0x293   : > { %2251 = vst.msk [vmem:[%s4078_s20 + $0x18] sm:$0xff] %vm1369_vm6, %v2832_v9  ;;  %v2713_v2 = vpop.f32.mrb[40].mxu0 }
 0x294   : > { %2249 = vst.msk [vmem:[%s4078_s20 + $0x8] sm:$0xff] %vm1369_vm6, %v2834_v18  ;;  %v1732_v46 = vadd.f32 %v2713_v2, %v4070_v40  ;;  %v1615_v27 = vpop.f32.mrb[41].mxu0 }
 0x295   : > { %v1730_v21 = vadd.f32 %v4070_v40, %v1615_v27  ;;  %v2714_v37 = vpop.f32.mrb[42].mxu0 }
 0x296   : > { %v1733_v10 = vadd.f32 %v2714_v37, %v4070_v40  ;;  %v1618_v28 = vpop.f32.mrb[43].mxu0  ;;  %v2801_v30 = vpop.f32.mrb[4].mxu1 }
 0x297   : > { %v1731_v44 = vadd.f32 %v4070_v40, %v1618_v28  ;;  %v2836_v13 = vadd.f32 %v2801_v30, %v1732_v46  ;;  %v2105_v43 = vpop.f32.mrb[5].mxu1 }
 0x298   : > { %v2838_v11 = vadd.f32 %v2105_v43, %v1730_v21  ;;  %v2802_v47 = vpop.f32.mrb[6].mxu1 }
 0x299   : > { %2254 = vst.msk [vmem:[%s4078_s20 + $0x30] sm:$0xff] %vm1369_vm6, %v2836_v13  ;;  %v2840_v36 = vadd.f32 %v2802_v47, %v1733_v10  ;;  %v2108_v38 = vpop.f32.mrb[7].mxu1 }
 0x29a   : > { %2252 = vst.msk [vmem:[%s4078_s20 + $0x20] sm:$0xff] %vm1369_vm6, %v2838_v11  ;;  %v2842_v3 = vadd.f32 %v2108_v38, %v1731_v44 }
 0x29b   : > { %2255 = vst.msk [vmem:[%s4078_s20 + $0x38] sm:$0xff] %vm1369_vm6, %v2840_v36  ;;  %v2717_v32 = vpop.f32.mrb[44].mxu0 }
 0x29c   : > { %2253 = vst.msk [vmem:[%s4078_s20 + $0x28] sm:$0xff] %vm1369_vm6, %v2842_v3  ;;  %v1736_v1 = vadd.f32 %v2717_v32, %v4070_v40  ;;  %v1631_v41 = vpop.f32.mrb[45].mxu0 }
 0x29d   : > { %v1734_v31 = vadd.f32 %v4070_v40, %v1631_v41  ;;  %v2718_v42 = vpop.f32.mrb[46].mxu0 }
 0x29e   : > { %v1737_v45 = vadd.f32 %v2718_v42, %v4070_v40  ;;  %v1634_v48 = vpop.f32.mrb[47].mxu0  ;;  %v2805_v49 = vpop.f32.mrb[8].mxu1 }
 0x29f   : > { %v1735_v0 = vadd.f32 %v4070_v40, %v1634_v48  ;;  %v2844_v56 = vadd.f32 %v2805_v49, %v1736_v1  ;;  %v2121_v55 = vpop.f32.mrb[9].mxu1 }
 0x2a0   : > { %v2846_v59 = vadd.f32 %v2121_v55, %v1734_v31  ;;  %v2806_v24 = vpop.f32.mrb[10].mxu1 }
 0x2a1   : > { %2258 = vst.msk [vmem:[%s4078_s20 + $0x50] sm:$0xff] %vm1369_vm6, %v2844_v56  ;;  %v2848_v57 = vadd.f32 %v2806_v24, %v1737_v45  ;;  %v2124_v33 = vpop.f32.mrb[11].mxu1 }
 0x2a2   : > { %2256 = vst.msk [vmem:[%s4078_s20 + $0x40] sm:$0xff] %vm1369_vm6, %v2846_v59  ;;  %v2850_v39 = vadd.f32 %v2124_v33, %v1735_v0 }
 0x2a3   : > { %2259 = vst.msk [vmem:[%s4078_s20 + $0x58] sm:$0xff] %vm1369_vm6, %v2848_v57  ;;  %v2721_v22 = vpop.f32.mrb[48].mxu0 }
 0x2a4   : > { %2257 = vst.msk [vmem:[%s4078_s20 + $0x48] sm:$0xff] %vm1369_vm6, %v2850_v39  ;;  %v1740_v50 = vadd.f32 %v2721_v22, %v4070_v40  ;;  %v1647_v58 = vpop.f32.mrb[49].mxu0 }
 0x2a5   : > { %v1738_v12 = vadd.f32 %v4070_v40, %v1647_v58  ;;  %v2722_v20 = vpop.f32.mrb[50].mxu0 }
 0x2a6   : > { %v1741_v25 = vadd.f32 %v2722_v20, %v4070_v40  ;;  %v1650_v5 = vpop.f32.mrb[51].mxu0  ;;  %v2809_v34 = vpop.f32.mrb[12].mxu1 }
 0x2a7   : > { %v1739_v17 = vadd.f32 %v4070_v40, %v1650_v5  ;;  %v2852_v8 = vadd.f32 %v2809_v34, %v1740_v50  ;;  %v2137_v52 = vpop.f32.mrb[13].mxu1 }
 0x2a8   : > { %v2854_v51 = vadd.f32 %v2137_v52, %v1738_v12  ;;  %v2810_v62 = vpop.f32.mrb[14].mxu1 }
 0x2a9   : > { %2262 = vst.msk [vmem:[%s4078_s20 + $0x70] sm:$0xff] %vm1369_vm6, %v2852_v8  ;;  %v2856_v23 = vadd.f32 %v2810_v62, %v1741_v25  ;;  %v2140_v35 = vpop.f32.mrb[15].mxu1 }
 0x2aa   : > { %2260 = vst.msk [vmem:[%s4078_s20 + $0x60] sm:$0xff] %vm1369_vm6, %v2854_v51  ;;  %v2858_v29 = vadd.f32 %v2140_v35, %v1739_v17 }
 0x2ab   : > { %2263 = vst.msk [vmem:[%s4078_s20 + $0x78] sm:$0xff] %vm1369_vm6, %v2856_v23  ;;  %v2725_v60 = vpop.f32.mrb[52].mxu0 }
 0x2ac   : > { %2261 = vst.msk [vmem:[%s4078_s20 + $0x68] sm:$0xff] %vm1369_vm6, %v2858_v29  ;;  %v1744_v61 = vadd.f32 %v2725_v60, %v4070_v40  ;;  %v1663_v63 = vpop.f32.mrb[53].mxu0 }
 0x2ad   : > { %v1742_v54 = vadd.f32 %v4070_v40, %v1663_v63  ;;  %v2726_v4 = vpop.f32.mrb[54].mxu0 }
 0x2ae   : > { %v1745_v53 = vadd.f32 %v2726_v4, %v4070_v40  ;;  %v1666_v15 = vpop.f32.mrb[55].mxu0  ;;  %v2813_v7 = vpop.f32.mrb[16].mxu1 }
 0x2af   : > { %v1743_v14 = vadd.f32 %v4070_v40, %v1666_v15  ;;  %v2860_v26 = vadd.f32 %v2813_v7, %v1744_v61  ;;  %v2153_v6 = vpop.f32.mrb[17].mxu1 }
 0x2b0   : > { %v2862_v19 = vadd.f32 %v2153_v6, %v1742_v54  ;;  %v2814_v9 = vpop.f32.mrb[18].mxu1 }
 0x2b1   : > { %2266 = vst.msk [vmem:[%s4078_s20 + $0x90] sm:$0xff] %vm1369_vm6, %v2860_v26  ;;  %v2864_v16 = vadd.f32 %v2814_v9, %v1745_v53  ;;  %v2156_v18 = vpop.f32.mrb[19].mxu1 }
 0x2b2   : > { %2264 = vst.msk [vmem:[%s4078_s20 + $0x80] sm:$0xff] %vm1369_vm6, %v2862_v19  ;;  %v2866_v2 = vadd.f32 %v2156_v18, %v1743_v14 }
 0x2b3   : > { %2267 = vst.msk [vmem:[%s4078_s20 + $0x98] sm:$0xff] %vm1369_vm6, %v2864_v16  ;;  %v2729_v46 = vpop.f32.mrb[56].mxu0 }
 0x2b4   : > { %2265 = vst.msk [vmem:[%s4078_s20 + $0x88] sm:$0xff] %vm1369_vm6, %v2866_v2  ;;  %v1748_v27 = vadd.f32 %v2729_v46, %v4070_v40  ;;  %v1679_v21 = vpop.f32.mrb[57].mxu0 }
 0x2b5   : > { %v1746_v37 = vadd.f32 %v4070_v40, %v1679_v21  ;;  %v2730_v10 = vpop.f32.mrb[58].mxu0 }
 0x2b6   : > { %v1749_v28 = vadd.f32 %v2730_v10, %v4070_v40  ;;  %v1682_v30 = vpop.f32.mrb[59].mxu0  ;;  %v2817_v44 = vpop.f32.mrb[20].mxu1 }
 0x2b7   : > { %v1747_v13 = vadd.f32 %v4070_v40, %v1682_v30  ;;  %v2868_v43 = vadd.f32 %v2817_v44, %v1748_v27  ;;  %v2169_v11 = vpop.f32.mrb[21].mxu1 }
 0x2b8   : > { %v2870_v47 = vadd.f32 %v2169_v11, %v1746_v37  ;;  %v2818_v36 = vpop.f32.mrb[22].mxu1 }
 0x2b9   : > { %2270 = vst.msk [vmem:[%s4078_s20 + $0xb0] sm:$0xff] %vm1369_vm6, %v2868_v43  ;;  %v2872_v38 = vadd.f32 %v2818_v36, %v1749_v28  ;;  %v2172_v3 = vpop.f32.mrb[23].mxu1 }
 0x2ba   : > { %2268 = vst.msk [vmem:[%s4078_s20 + $0xa0] sm:$0xff] %vm1369_vm6, %v2870_v47  ;;  %v2874_v32 = vadd.f32 %v2172_v3, %v1747_v13 }
 0x2bb   : > { %2271 = vst.msk [vmem:[%s4078_s20 + $0xb8] sm:$0xff] %vm1369_vm6, %v2872_v38  ;;  %v2733_v1 = vpop.f32.mrb[60].mxu0 }
 0x2bc   : > { %2269 = vst.msk [vmem:[%s4078_s20 + $0xa8] sm:$0xff] %vm1369_vm6, %v2874_v32  ;;  %v1752_v41 = vadd.f32 %v2733_v1, %v4070_v40  ;;  %v1695_v31 = vpop.f32.mrb[61].mxu0 }
 0x2bd   : > { %v1750_v42 = vadd.f32 %v4070_v40, %v1695_v31  ;;  %v2734_v45 = vpop.f32.mrb[62].mxu0 }
 0x2be   : > { %v1753_v48 = vadd.f32 %v2734_v45, %v4070_v40  ;;  %v1698_v49 = vpop.f32.mrb[63].mxu0  ;;  %v2821_v0 = vpop.f32.mrb[24].mxu1 }
 0x2bf   : > { %v1751_v56 = vadd.f32 %v4070_v40, %v1698_v49  ;;  %v2876_v55 = vadd.f32 %v2821_v0, %v1752_v41  ;;  %v2185_v59 = vpop.f32.mrb[25].mxu1 }
 0x2c0   : > { %v2878_v24 = vadd.f32 %v2185_v59, %v1750_v42  ;;  %v2822_v57 = vpop.f32.mrb[26].mxu1 }
 0x2c1   : > { %2274 = vst.msk [vmem:[%s4078_s20 + $0xd0] sm:$0xff] %vm1369_vm6, %v2876_v55  ;;  %v2880_v33 = vadd.f32 %v2822_v57, %v1753_v48  ;;  %v2188_v39 = vpop.f32.mrb[27].mxu1 }
 0x2c2   : > { %2272 = vst.msk [vmem:[%s4078_s20 + $0xc0] sm:$0xff] %vm1369_vm6, %v2878_v24  ;;  %v2882_v22 = vadd.f32 %v2188_v39, %v1751_v56 }
 0x2c3   : > { %2275 = vst.msk [vmem:[%s4078_s20 + $0xd8] sm:$0xff] %vm1369_vm6, %v2880_v33  ;;  %v2737_v50 = vpop.f32.mrb[64].mxu0 }
 0x2c4   : > { %2273 = vst.msk [vmem:[%s4078_s20 + $0xc8] sm:$0xff] %vm1369_vm6, %v2882_v22  ;;  %v1756_v58 = vadd.f32 %v2737_v50, %v4070_v40  ;;  %v1711_v12 = vpop.f32.mrb[65].mxu0 }
 0x2c5   : > { %v1754_v20 = vadd.f32 %v4070_v40, %v1711_v12  ;;  %v2738_v25 = vpop.f32.mrb[66].mxu0 }
 0x2c6   : > { %v1757_v5 = vadd.f32 %v2738_v25, %v4070_v40  ;;  %v1714_v34 = vpop.f32.mrb[67].mxu0  ;;  %v2825_v17 = vpop.f32.mrb[28].mxu1 }
 0x2c7   : > { %v1755_v8 = vadd.f32 %v4070_v40, %v1714_v34  ;;  %v2884_v52 = vadd.f32 %v2825_v17, %v1756_v58  ;;  %v2201_v51 = vpop.f32.mrb[29].mxu1 }
 0x2c8   : > { %v2886_v62 = vadd.f32 %v2201_v51, %v1754_v20  ;;  %v2826_v23 = vpop.f32.mrb[30].mxu1 }
 0x2c9   : > { %2278 = vst.msk [vmem:[%s4078_s20 + $0xf0] sm:$0xff] %vm1369_vm6, %v2884_v52  ;;  %v2888_v35 = vadd.f32 %v2826_v23, %v1757_v5  ;;  %v2204_v29 = vpop.f32.mrb[31].mxu1 }
 0x2ca   : > { %2276 = vst.msk [vmem:[%s4078_s20 + $0xe0] sm:$0xff] %vm1369_vm6, %v2886_v62  ;;  %v2890_v40 = vadd.f32 %v2204_v29, %v1755_v8 }
 0x2cb   : > { %2279 = vst.msk [vmem:[%s4078_s20 + $0xf8] sm:$0xff] %vm1369_vm6, %v2888_v35 }
 0x2cc   : > { %2277 = vst.msk [vmem:[%s4078_s20 + $0xe8] sm:$0xff] %vm1369_vm6, %v2890_v40 }
 0x2cd   : > { %3213 = shalt.err (!%p3210_p5)
}
 0x2ce   : > { %s3214_s18 = scalar_lea.hbm %s4171_s10, 4096  ;;  %s3218_s20 = scalar_lea.hbm %s4236_s7, 8192 }
 0x2cf   : > { %p3215_p6 = scmp.ne.s32.totalorder %s4171_s10, %s3214_s18  ;;  %p3219_p10 = scmp.lt.u32.totalorder %s4171_s10, %s4236_s7 }
 0x2d0   : > { %p3220_p11 = scmp.lt.u32.totalorder %s3218_s20, %s3214_s18  ;;  %p3222_p13 = scmp.lt.u32.totalorder %s3214_s18, %s4171_s10 }
 0x2d1   : > { %p3216_p7 = pnand %p3215_p6, %p3366_p4 }
 0x2d2   : > { %p3221_p12 = por %p3220_p11, %p3219_p10 }
 0x2d3   : > { %p3217_p9 = pneg %p3216_p7 }
 0x2d4   : > { %p3223_p0 = por %p3222_p13, %p3221_p12 }
 0x2d6   : > { %p3224_p1 = pnand %p3223_p0, %p3217_p9 }
 0x2d8   : > { %3227 = shalt.err (!%p3224_p1)
}
 0x2d9   : > { %s3284_s8 = smov 128   ;;  %s3285_s12 = smov 8  }
 0x2da   : > { %2924 = dma.vmem_to_hbm [thread:$0]  (%p3366_p4), %s4173_s23, 4096, %s4171_s10, %s4183_s27, %s3284_s8, %s3284_s8, %s3285_s12  }
 0x2db PF: > { %p2930_p2 = scmp.ge.s32.totalorder %s3278_s29, 2  ;;  %s2312_s15 = sand.u32 1, %s3258_s24  }
 0x2dc   : > { %s2313_s16 = scalar_lea.sflag [#allocation3], %s2312_s15 }
 0x2dd   : > { %p2927_p3 = pnand %p2930_p2, %p3373_p8 }
 0x2df   : > { %3253 = dma.done.wait (!%p2927_p3), %s2313_s16, 4096  }
 0x2e0   : > { %3255 = vsyncadd (!%p2927_p3), %s2313_s16, 4294963200  ;;  %s20_s29 = sadd.s32 1, %s3278_s29   ;;  %s4239_s24 = smov %s3262_s25 }
 0x2e1   : > { %p17_p5 = scmp.ge.s32.totalorder %s20_s29, 4   ;;  %s4240_s25 = smov %s3266_s26 }
 0x2e2   : > { %s4241_s26 = smov %s3379_s14  ;;  %s4242_s27 = smov %s3274_s28 }
 0x2e3   : > { %s4243_s28 = smov %s4245_s9  ;;  %19 = sbr.rel (!%p17_p5) target bundleno = 4 (0x4), region = 91 }
 0x2ea   :  { %2318 = vsyncpa [#allocation3], 1 }
 0x2eb   :  { %2320 = vsyncpa [#allocation3 + $0x1], 1 }

</bundles_post_ra>
